<compile_context>
chip_gen: v5e
topology: v5e:2x2
jax: 0.10.0
libtpu: 0.0.40
codegen_flags: <defaults>
</compile_context>

<pallas_src>
import functools
import math

import jax
import jax.numpy as jnp
import numpy as np
from jax import lax
from jax.experimental import pallas as pl
from jax.experimental.pallas import tpu as pltpu


def _cross_attn_project_kernel(lens_ref, x_ref, w_ref, b_ref, s_ref, z_ref, *,
                               num_heads, head_dim, proj_dim, seq_tile):
    b = pl.program_id(0)
    shard = pl.program_id(1)
    st = pl.program_id(2)
    n_st = pl.num_programs(2)
    H, Dh, K = num_heads, head_dim, proj_dim
    HK = H * K

    @pl.when(st == 0)
    def _init():
        s_ref[...] = jnp.zeros_like(s_ref)
        z_ref[...] = jnp.zeros_like(z_ref)

    length = lens_ref[b]
    tile_start = (shard * n_st + st) * seq_tile

    # Skip fully padded sequence tiles (suffix padding); exact because the
    # accumulators are unchanged on all-pad tiles.
    @pl.when(tile_start < length)
    def _compute():
        x = x_ref[...].astype(jnp.bfloat16)                       # [tS, E]
        # Single fused projection: [proj_all | v] = x @ [Wkr | Wv^T] + [bkr|bv]
        pv = jnp.dot(x, w_ref[...],
                     preferred_element_type=jnp.float32) + b_ref[...]
        proj = pv[:, :HK]                                         # [tS, H*K] f32
        v = pv[:, HK:]                                            # [tS, E]   f32

        # Padding mask rebuilt from the scalar-prefetched length.  8 identical
        # lane columns so the z matmul below has a >= 8-row LHS.
        pos = tile_start + lax.broadcasted_iota(jnp.int32, (seq_tile, 8), 0)
        keep8 = (pos < length).astype(jnp.float32)                # [tS, 8]
        keep = keep8[:, 0:1]                                      # [tS, 1]
        keep_mx = keep8.astype(jnp.bfloat16)

        # Masking v is equivalent to masking phi inside the s contraction.
        # TODO(synk): multiply-masking propagates NaN/Inf from padded positions
        # of the boundary tile; use a select if non-finite pads are possible.
        vk = (v * keep).astype(jnp.bfloat16)                      # [tS, E]
        sin_bf = jnp.sin(proj).astype(jnp.bfloat16)               # [tS, H*K]
        cos_bf = jnp.cos(proj).astype(jnp.bfloat16)

        dn = (((0,), (0,)), ((), ()))
        # z = sum_s keep_s * phi_s on the MXU: keep^T @ phi, one matmul per
        # half covering all heads (layout: [sin(h,k) | cos(h,k)]).
        z_sin = lax.dot_general(keep_mx, sin_bf, dn,
                                preferred_element_type=jnp.float32)[0:1, :]
        z_cos = lax.dot_general(keep_mx, cos_bf, dn,
                                preferred_element_type=jnp.float32)[0:1, :]
        z_ref[:, :HK] += z_sin
        z_ref[:, HK:] += z_cos

        # s: per-head phi^T @ v, retired straight into the VMEM-resident
        # output block (rows 0:K = sin half, K:2K = cos half).
        for h in range(H):                                        # static unroll
            vh = vk[:, h * Dh:(h + 1) * Dh]                       # [tS, Dh]
            s_sin = lax.dot_general(sin_bf[:, h * K:(h + 1) * K], vh, dn,
                                    preferred_element_type=jnp.float32)
            s_cos = lax.dot_general(cos_bf[:, h * K:(h + 1) * K], vh, dn,
                                    preferred_element_type=jnp.float32)
            s_ref[0:K, h * Dh:(h + 1) * Dh] += s_sin
            s_ref[K:2 * K, h * Dh:(h + 1) * Dh] += s_cos

    @pl.when(st == n_st - 1)
    def _finalize():
        # phi normalization applied once to the small accumulated results.
        scale = proj_dim ** -0.5
        s_ref[...] = s_ref[...] * scale
        z_ref[...] = z_ref[...] * scale


def cross_attention_project_layer(encoder_output, random_matrices, params,
                                  lengths=None, *, tau=1.0, reparam_proj=True,
                                  seq_tile=512, seq_shards=None):
    """Forward pass of CrossAttentionProjectLayer.

    encoder_output : [seq_len, bsz, embed_dim] float32
    random_matrices: [num_heads, proj_dim, head_dim] float32
    lengths        : optional [bsz] int32 valid-sequence lengths (suffix padding).
                     TODO(synk): arbitrary (non suffix-padding) boolean masks
                     would need a dense keep-tensor input path.

    Returns (s, z, scaled_random_matrices, tau) with
      s: [bsz, num_heads, 2*proj_dim, head_dim],  z: [bsz, num_heads, 2*proj_dim].
    """
    S, B, E = encoder_output.shape
    H, K, Dh = random_matrices.shape
    assert H * Dh == E
    HK = H * K
    K2 = 2 * K

    # build_random_matrices: rm' = (sigma * rm) / tau (tiny, plain JAX, f32).
    rm = random_matrices
    if reparam_proj:
        rm = params["sigma"] * rm
    rm = (rm / tau).astype(jnp.float32)                 # returned to the caller

    # Fold rm' into the k-projection weight (f32, exact) and fuse with the v
    # projection into one (E, H*K + E) weight -> a single MXU matmul per tile.
    wk = params["k_w"].astype(jnp.float32)              # [E_out, E_in] torch Linear
    bk = params["k_b"].astype(jnp.float32)
    wkr = jnp.einsum("hdi,hkd->ihk", wk.reshape(H, Dh, E), rm).reshape(E, HK)
    bkr = jnp.einsum("hd,hkd->hk", bk.reshape(H, Dh), rm).reshape(HK)
    # TODO(synk): v_w.T is an XLA transpose over an ExE weight; only matters if
    # the weights are not constant-folded across calls (e.g. training).
    w_comb = jnp.concatenate(
        [wkr, params["v_w"].astype(jnp.float32).T], axis=1).astype(jnp.bfloat16)
    b_comb = jnp.concatenate(
        [bkr, params["v_b"].astype(jnp.float32)], axis=0
    ).reshape(1, HK + E).astype(jnp.float32)

    if lengths is None:
        lengths = jnp.full((B,), S, jnp.int32)
    lengths = lengths.astype(jnp.int32)

    ts = min(seq_tile, S)
    assert S % ts == 0, "seq_len must be divisible by the sequence tile"
    assert ts % 8 == 0 or ts == S, "sequence tile must be a multiple of 8"
    n_st_total = S // ts
    if seq_shards is None:
        seq_shards = 2 if B == 1 else 1    # keep both v7x TensorCores busy at bsz=1
    NS = seq_shards if (seq_shards > 0 and n_st_total % seq_shards == 0) else 1
    n_st = n_st_total // NS

    # Read x from the native [S, B, E] layout (viewed as [S, B*E]) whenever the
    # per-batch lane block is 128-aligned; removes the wrapper-side transpose
    # (a full extra HBM pass over the activations).
    native_x = (E % 128 == 0) or (B == 1)
    if native_x:
        x_in = encoder_output.reshape(S, B * E)          # no-copy view, f32
    else:
        x_in = jnp.transpose(encoder_output, (1, 0, 2)).astype(jnp.bfloat16)

    kernel = functools.partial(_cross_attn_project_kernel,
                               num_heads=H, head_dim=Dh, proj_dim=K, seq_tile=ts)

    def _call(single_buffer_weights):
        # Grid-invariant operands only need a single VMEM buffer.
        wkw = dict(pipeline_mode=pl.Buffered(1)) if single_buffer_weights else {}
        if native_x:
            x_spec = pl.BlockSpec((ts, E),
                                  lambda b, sh, st, lens: (sh * n_st + st, b))
        else:
            x_spec = pl.BlockSpec((None, ts, E),
                                  lambda b, sh, st, lens: (b, sh * n_st + st, 0))
        grid_spec = pltpu.PrefetchScalarGridSpec(
            num_scalar_prefetch=1,                       # lengths -> SMEM
            grid=(B, NS, n_st),                          # seq tiles = reduction (last)
            in_specs=[
                x_spec,
                pl.BlockSpec((E, HK + E), lambda b, sh, st, lens: (0, 0), **wkw),
                pl.BlockSpec((1, HK + E), lambda b, sh, st, lens: (0, 0), **wkw),
            ],
            out_specs=[
                pl.BlockSpec((None, K2, E),
                             lambda b, sh, st, lens: (b * NS + sh, 0, 0)),
                pl.BlockSpec((None, 1, 2 * HK),
                             lambda b, sh, st, lens: (b * NS + sh, 0, 0)),
            ],
        )
        return pl.pallas_call(
            kernel,
            grid_spec=grid_spec,
            out_shape=[
                jax.ShapeDtypeStruct((B * NS, K2, E), jnp.float32),
                jax.ShapeDtypeStruct((B * NS, 1, 2 * HK), jnp.float32),
            ],
            compiler_params=pltpu.CompilerParams(
                dimension_semantics=("parallel", "parallel", "arbitrary"),
                # Above the 16/32 MiB scoped defaults, below v7x's 64 MiB physical.
                vmem_limit_bytes=48 * 1024 * 1024),
        )(lengths, x_in, w_comb, b_comb)

    try:
        s_p, z_p = _call(True)
    except Exception:
        # TODO(synk): pl.Buffered(1) single-buffering of grid-invariant weights
        # is unsupported on this jax version; fall back to default buffering.
        s_p, z_p = _call(False)

    # Combine sequence-shard partial sums (already scaled; the sum is linear).
    s_flat = jnp.sum(s_p.reshape(B, NS, K2, E), axis=1)            # [B, 2K, E]
    z_flat = jnp.sum(z_p.reshape(B, NS, 2 * HK), axis=1)           # [B, 2*H*K]

    s = jnp.transpose(s_flat.reshape(B, K2, H, Dh), (0, 2, 1, 3))  # [B, H, 2K, Dh]
    z = jnp.transpose(z_flat.reshape(B, 2, H, K), (0, 2, 1, 3)).reshape(B, H, K2)
    return s, z, rm, tau


def _reference_forward(encoder_output, random_matrices, params, mask, tau):
    """Plain-JAX f32 reference mirroring the PyTorch module."""
    S, B, E = encoder_output.shape
    H, K, Dh = random_matrices.shape
    k = encoder_output @ params["k_w"].T + params["k_b"]
    v = encoder_output @ params["v_w"].T + params["v_b"]
    k = k.reshape(S, B, H, Dh)
    v = v.reshape(S, B, H, Dh)
    rm = params["sigma"] * random_matrices / tau
    proj = jnp.einsum("sbhd,hkd->sbhk", k, rm)
    phi = jnp.concatenate([jnp.sin(proj), jnp.cos(proj)], -1) * K ** -0.5
    if mask is not None:
        phi = jnp.where(mask, 0.0, phi)
    s = jnp.einsum("sbhk,sbhd->bhkd", phi, v)
    z = jnp.sum(phi, axis=0)
    return s, z, rm


if __name__ == "__main__":
    # Small shapes consistent with the module.  E = 128 exercises the native
    # (no-transpose) x path; seq_tile=8 / seq_shards=2 exercise the sharded
    # reduction grid, the tile-skip path, and the boundary-tile padding mask.
    B, S = 2, 32
    H, Dh, K = 4, 32, 8
    E = H * Dh            # embed_dim = 128
    tau = 1.0

    key = jax.random.PRNGKey(0)
    k1, k2, k3, k4, k5, k6 = jax.random.split(key, 6)

    # Deterministic init (xavier_uniform, gain 1/sqrt(2); Linear bias default).
    w_bound = math.sqrt(6.0 / (E + E)) / math.sqrt(2.0)
    b_bound = 1.0 / math.sqrt(E)
    params = {
        "k_w": jax.random.uniform(k1, (E, E), jnp.float32, -w_bound, w_bound),
        "k_b": jax.random.uniform(k3, (E,), jnp.float32, -b_bound, b_bound),
        "v_w": jax.random.uniform(k2, (E, E), jnp.float32, -w_bound, w_bound),
        "v_b": jax.random.uniform(k4, (E,), jnp.float32, -b_bound, b_bound),
        "sigma": jnp.ones((H, 1, Dh), jnp.float32),   # nn.init.constant_(sigma, 1.0)
    }

    encoder_output = jax.random.normal(k5, (S, B, E), jnp.float32)
    # Scaled like typical RFA random features; keeps |proj| (the sin/cos phase)
    # well inside the bf16-MXU test tolerance.
    random_matrices = jax.random.normal(k6, (H, K, Dh), jnp.float32) * (Dh ** -0.5)
    # Suffix padding: batch 1 has two fully padded tiles (exercises the skip)
    # and one partially padded tile (exercises the in-tile mask).
    lengths = jnp.array([S, 13], jnp.int32)

    s, z, rm_out, tau_out = cross_attention_project_layer(
        encoder_output, random_matrices, params, lengths,
        tau=tau, reparam_proj=True, seq_tile=8, seq_shards=2)
    jax.block_until_ready((s, z, rm_out))

    mask = (jnp.arange(S)[:, None] >= lengths[None, :]).reshape(S, B, 1, 1)
    s_want, z_want, rm_want = _reference_forward(
        encoder_output, random_matrices, params, mask, tau)

    assert s.shape == (B, H, 2 * K, Dh) and z.shape == (B, H, 2 * K)
    # Tolerance loosened vs the pure-f32 reference because MXU operands are
    # bf16 (sin/cos phases are rounding-sensitive); values here are O(1).
    np.testing.assert_allclose(np.asarray(s), np.asarray(s_want), rtol=5e-2, atol=5e-2)
    np.testing.assert_allclose(np.asarray(z), np.asarray(z_want), rtol=5e-2, atol=5e-2)
    np.testing.assert_allclose(np.asarray(rm_out), np.asarray(rm_want), rtol=1e-6, atol=1e-6)

    print("KERNEL_OK")
</pallas_src>

<mosaic_0001>
module attributes {stable_mosaic.version = 11 : i64} {
  func.func @_cross_attn_project_kernel(%arg0: i32, %arg1: i32, %arg2: i32, %arg3: memref<2xi32, #tpu.memory_space<smem>>, %arg4: memref<8x128xf32, #tpu.memory_space<vmem>>, %arg5: memref<128x160xbf16, #tpu.memory_space<vmem>>, %arg6: memref<1x160xf32, #tpu.memory_space<vmem>>, %arg7: memref<1x16x128xf32, #tpu.memory_space<vmem>>, %arg8: memref<1x1x64xf32, #tpu.memory_space<vmem>>) attributes {dimension_semantics = [#tpu.dimension_semantics<parallel>, #tpu.dimension_semantics<parallel>, #tpu.dimension_semantics<arbitrary>], iteration_bounds = array<i64: 2, 2, 2>, scalar_prefetch = 1 : i64, scratch_operands = 0 : i64, tpu.core_type = #tpu.core_type<tc>, window_params = [{transform_indices = @transform_0, window_bounds = array<i64: 8, 128>}, {pipeline_mode = #tpu.pipeline_mode<synchronous>, transform_indices = @transform_1, window_bounds = array<i64: 128, 160>}, {pipeline_mode = #tpu.pipeline_mode<synchronous>, transform_indices = @transform_2, window_bounds = array<i64: 1, 160>}, {transform_indices = @transform_3, window_bounds = array<i64: 1, 16, 128>}, {transform_indices = @transform_4, window_bounds = array<i64: 1, 1, 64>}]} {
    %c0_i32 = arith.constant 0 : i32
    %0 = arith.cmpi eq, %arg2, %c0_i32 : i32
    %1 = arith.extui %0 : i1 to i32
    %c0_i32_0 = arith.constant 0 : i32
    %2 = arith.cmpi ne, %1, %c0_i32_0 : i32
    scf.if %2 {
      %cst = arith.constant 0.000000e+00 : f32
      %14 = vector.broadcast %cst : f32 to vector<16x128xf32>
      %c0 = arith.constant 0 : index
      %c0_3 = arith.constant 0 : index
      %c0_4 = arith.constant 0 : index
      %15 = vector.load %arg7[%c0, %c0_3, %c0_4] : memref<1x16x128xf32, #tpu.memory_space<vmem>>, vector<1x16x128xf32>
      %16 = vector.shape_cast %15 : vector<1x16x128xf32> to vector<16x128xf32>
      %17 = vector.shape_cast %14 : vector<16x128xf32> to vector<1x16x128xf32>
      tpu.vector_store %arg7[%c0, %c0_3, %c0_4], %17 {strides = array<i32>} : memref<1x16x128xf32, #tpu.memory_space<vmem>>, vector<1x16x128xf32>,
      %cst_5 = arith.constant 0.000000e+00 : f32
      %18 = vector.broadcast %cst_5 : f32 to vector<1x64xf32>
      %c0_6 = arith.constant 0 : index
      %c0_7 = arith.constant 0 : index
      %c0_8 = arith.constant 0 : index
      %19 = vector.load %arg8[%c0_6, %c0_7, %c0_8] : memref<1x1x64xf32, #tpu.memory_space<vmem>>, vector<1x1x64xf32>
      %20 = vector.shape_cast %19 : vector<1x1x64xf32> to vector<1x64xf32>
      %21 = vector.shape_cast %18 : vector<1x64xf32> to vector<1x1x64xf32>
      tpu.vector_store %arg8[%c0_6, %c0_7, %c0_8], %21 {strides = array<i32>} : memref<1x1x64xf32, #tpu.memory_space<vmem>>, vector<1x1x64xf32>,
    } else {
    }
    %3 = arith.index_cast %arg0 : i32 to index
    %4 = memref.load %arg3[%3] : memref<2xi32, #tpu.memory_space<smem>>
    %c2_i32 = arith.constant 2 : i32
    %5 = arith.muli %arg1, %c2_i32 : i32
    %6 = arith.addi %5, %arg2 : i32
    %c8_i32 = arith.constant 8 : i32
    %7 = arith.muli %6, %c8_i32 : i32
    %8 = arith.cmpi slt, %7, %4 : i32
    %9 = arith.extui %8 : i1 to i32
    %c0_i32_1 = arith.constant 0 : i32
    %10 = arith.cmpi ne, %9, %c0_i32_1 : i32
    scf.if %10 {
      %c0 = arith.constant 0 : index
      %c0_3 = arith.constant 0 : index
      %14 = vector.load %arg4[%c0, %c0_3] : memref<8x128xf32, #tpu.memory_space<vmem>>, vector<8x128xf32>
      %15 = arith.truncf %14 : vector<8x128xf32> to vector<8x128xbf16>
      %c0_4 = arith.constant 0 : index
      %c0_5 = arith.constant 0 : index
      %16 = vector.load %arg5[%c0_4, %c0_5] : memref<128x160xbf16, #tpu.memory_space<vmem>>, vector<128x160xbf16>
      %cst = arith.constant dense<0.000000e+00> : vector<8x160xf32>
      %17 = tpu.matmul %15, %16, %cst {dimension_numbers = #tpu.dot_dimension_numbers<[1], [0], [0], [1], [0, 0, 1, 1], [], []>} : vector<8x128xbf16>, vector<128x160xbf16>, vector<8x160xf32> -> vector<8x160xf32>
      %c0_6 = arith.constant 0 : index
      %c0_7 = arith.constant 0 : index
      %18 = vector.load %arg6[%c0_6, %c0_7] : memref<1x160xf32, #tpu.memory_space<vmem>>, vector<1x160xf32>
      %19 = vector.broadcast %18 : vector<1x160xf32> to vector<8x160xf32>
      %20 = arith.addf %17, %19 : vector<8x160xf32>
      %21 = vector.extract_strided_slice %20 {offsets = [0, 0], sizes = [8, 32], strides = [1, 1]} : vector<8x160xf32> to vector<8x32xf32>
      %22 = vector.extract_strided_slice %20 {offsets = [0, 32], sizes = [8, 128], strides = [1, 1]} : vector<8x160xf32> to vector<8x128xf32>
      %23 = tpu.iota {dimensions = array<i32: 0>} : vector<8x8xi32>
      %24 = vector.broadcast %7 : i32 to vector<8x8xi32>
      %25 = arith.addi %24, %23 : vector<8x8xi32>
      %26 = vector.broadcast %4 : i32 to vector<8x8xi32>
      %27 = arith.cmpi slt, %25, %26 : vector<8x8xi32>
      %28 = arith.extui %27 : vector<8x8xi1> to vector<8x8xi32>
      %29 = arith.sitofp %28 : vector<8x8xi32> to vector<8x8xf32>
      %30 = vector.extract_strided_slice %29 {offsets = [0, 0], sizes = [8, 1], strides = [1, 1]} : vector<8x8xf32> to vector<8x1xf32>
      %31 = arith.truncf %29 : vector<8x8xf32> to vector<8x8xbf16>
      %32 = vector.broadcast %30 : vector<8x1xf32> to vector<8x128xf32>
      %33 = arith.mulf %22, %32 : vector<8x128xf32>
      %34 = arith.truncf %33 : vector<8x128xf32> to vector<8x128xbf16>
      %35 = math.sin %21 : vector<8x32xf32>
      %36 = arith.truncf %35 : vector<8x32xf32> to vector<8x32xbf16>
      %37 = math.cos %21 : vector<8x32xf32>
      %38 = arith.truncf %37 : vector<8x32xf32> to vector<8x32xbf16>
      %cst_8 = arith.constant dense<0.000000e+00> : vector<8x32xf32>
      %39 = tpu.matmul %31, %36, %cst_8 {dimension_numbers = #tpu.dot_dimension_numbers<[0], [0], [1], [1], [0, 1, 1, 1], [], []>} : vector<8x8xbf16>, vector<8x32xbf16>, vector<8x32xf32> -> vector<8x32xf32>
      %40 = vector.extract_strided_slice %39 {offsets = [0, 0], sizes = [1, 32], strides = [1, 1]} : vector<8x32xf32> to vector<1x32xf32>
      %cst_9 = arith.constant dense<0.000000e+00> : vector<8x32xf32>
      %41 = tpu.matmul %31, %38, %cst_9 {dimension_numbers = #tpu.dot_dimension_numbers<[0], [0], [1], [1], [0, 1, 1, 1], [], []>} : vector<8x8xbf16>, vector<8x32xbf16>, vector<8x32xf32> -> vector<8x32xf32>
      %42 = vector.extract_strided_slice %41 {offsets = [0, 0], sizes = [1, 32], strides = [1, 1]} : vector<8x32xf32> to vector<1x32xf32>
      %c0_10 = arith.constant 0 : index
      %c0_11 = arith.constant 0 : index
      %c0_12 = arith.constant 0 : index
      %43 = vector.load %arg8[%c0_10, %c0_11, %c0_12] : memref<1x1x64xf32, #tpu.memory_space<vmem>>, vector<1x1x32xf32>
      %44 = vector.shape_cast %43 : vector<1x1x32xf32> to vector<1x32xf32>
      %45 = arith.addf %44, %40 : vector<1x32xf32>
      %c0_13 = arith.constant 0 : index
      %c0_14 = arith.constant 0 : index
      %c0_15 = arith.constant 0 : index
      %46 = vector.load %arg8[%c0_13, %c0_14, %c0_15] : memref<1x1x64xf32, #tpu.memory_space<vmem>>, vector<1x1x32xf32>
      %47 = vector.shape_cast %46 : vector<1x1x32xf32> to vector<1x32xf32>
      %48 = vector.shape_cast %45 : vector<1x32xf32> to vector<1x1x32xf32>
      tpu.vector_store %arg8[%c0_13, %c0_14, %c0_15], %48 {strides = array<i32>} : memref<1x1x64xf32, #tpu.memory_space<vmem>>, vector<1x1x32xf32>,
      %c0_16 = arith.constant 0 : index
      %c0_17 = arith.constant 0 : index
      %c32 = arith.constant 32 : index
      %49 = vector.load %arg8[%c0_16, %c0_17, %c32] : memref<1x1x64xf32, #tpu.memory_space<vmem>>, vector<1x1x32xf32>
      %50 = vector.shape_cast %49 : vector<1x1x32xf32> to vector<1x32xf32>
      %51 = arith.addf %50, %42 : vector<1x32xf32>
      %c0_18 = arith.constant 0 : index
      %c0_19 = arith.constant 0 : index
      %c32_20 = arith.constant 32 : index
      %52 = vector.load %arg8[%c0_18, %c0_19, %c32_20] : memref<1x1x64xf32, #tpu.memory_space<vmem>>, vector<1x1x32xf32>
      %53 = vector.shape_cast %52 : vector<1x1x32xf32> to vector<1x32xf32>
      %54 = vector.shape_cast %51 : vector<1x32xf32> to vector<1x1x32xf32>
      tpu.vector_store %arg8[%c0_18, %c0_19, %c32_20], %54 {strides = array<i32>} : memref<1x1x64xf32, #tpu.memory_space<vmem>>, vector<1x1x32xf32>,
      %55 = vector.extract_strided_slice %34 {offsets = [0, 0], sizes = [8, 32], strides = [1, 1]} : vector<8x128xbf16> to vector<8x32xbf16>
      %56 = vector.extract_strided_slice %36 {offsets = [0, 0], sizes = [8, 8], strides = [1, 1]} : vector<8x32xbf16> to vector<8x8xbf16>
      %cst_21 = arith.constant dense<0.000000e+00> : vector<8x32xf32>
      %57 = tpu.matmul %56, %55, %cst_21 {dimension_numbers = #tpu.dot_dimension_numbers<[0], [0], [1], [1], [0, 1, 1, 1], [], []>} : vector<8x8xbf16>, vector<8x32xbf16>, vector<8x32xf32> -> vector<8x32xf32>
      %58 = vector.extract_strided_slice %38 {offsets = [0, 0], sizes = [8, 8], strides = [1, 1]} : vector<8x32xbf16> to vector<8x8xbf16>
      %cst_22 = arith.constant dense<0.000000e+00> : vector<8x32xf32>
      %59 = tpu.matmul %58, %55, %cst_22 {dimension_numbers = #tpu.dot_dimension_numbers<[0], [0], [1], [1], [0, 1, 1, 1], [], []>} : vector<8x8xbf16>, vector<8x32xbf16>, vector<8x32xf32> -> vector<8x32xf32>
      %c0_23 = arith.constant 0 : index
      %c0_24 = arith.constant 0 : index
      %c0_25 = arith.constant 0 : index
      %60 = vector.load %arg7[%c0_23, %c0_24, %c0_25] : memref<1x16x128xf32, #tpu.memory_space<vmem>>, vector<1x8x32xf32>
      %61 = vector.shape_cast %60 : vector<1x8x32xf32> to vector<8x32xf32>
      %62 = arith.addf %61, %57 : vector<8x32xf32>
      %c0_26 = arith.constant 0 : index
      %c0_27 = arith.constant 0 : index
      %c0_28 = arith.constant 0 : index
      %63 = vector.load %arg7[%c0_26, %c0_27, %c0_28] : memref<1x16x128xf32, #tpu.memory_space<vmem>>, vector<1x8x32xf32>
      %64 = vector.shape_cast %63 : vector<1x8x32xf32> to vector<8x32xf32>
      %65 = vector.shape_cast %62 : vector<8x32xf32> to vector<1x8x32xf32>
      tpu.vector_store %arg7[%c0_26, %c0_27, %c0_28], %65 {strides = array<i32>} : memref<1x16x128xf32, #tpu.memory_space<vmem>>, vector<1x8x32xf32>,
      %c0_29 = arith.constant 0 : index
      %c8 = arith.constant 8 : index
      %c0_30 = arith.constant 0 : index
      %66 = vector.load %arg7[%c0_29, %c8, %c0_30] : memref<1x16x128xf32, #tpu.memory_space<vmem>>, vector<1x8x32xf32>
      %67 = vector.shape_cast %66 : vector<1x8x32xf32> to vector<8x32xf32>
      %68 = arith.addf %67, %59 : vector<8x32xf32>
      %c0_31 = arith.constant 0 : index
      %c8_32 = arith.constant 8 : index
      %c0_33 = arith.constant 0 : index
      %69 = vector.load %arg7[%c0_31, %c8_32, %c0_33] : memref<1x16x128xf32, #tpu.memory_space<vmem>>, vector<1x8x32xf32>
      %70 = vector.shape_cast %69 : vector<1x8x32xf32> to vector<8x32xf32>
      %71 = vector.shape_cast %68 : vector<8x32xf32> to vector<1x8x32xf32>
      tpu.vector_store %arg7[%c0_31, %c8_32, %c0_33], %71 {strides = array<i32>} : memref<1x16x128xf32, #tpu.memory_space<vmem>>, vector<1x8x32xf32>,
      %72 = vector.extract_strided_slice %34 {offsets = [0, 32], sizes = [8, 32], strides = [1, 1]} : vector<8x128xbf16> to vector<8x32xbf16>
      %73 = vector.extract_strided_slice %36 {offsets = [0, 8], sizes = [8, 8], strides = [1, 1]} : vector<8x32xbf16> to vector<8x8xbf16>
      %cst_34 = arith.constant dense<0.000000e+00> : vector<8x32xf32>
      %74 = tpu.matmul %73, %72, %cst_34 {dimension_numbers = #tpu.dot_dimension_numbers<[0], [0], [1], [1], [0, 1, 1, 1], [], []>} : vector<8x8xbf16>, vector<8x32xbf16>, vector<8x32xf32> -> vector<8x32xf32>
      %75 = vector.extract_strided_slice %38 {offsets = [0, 8], sizes = [8, 8], strides = [1, 1]} : vector<8x32xbf16> to vector<8x8xbf16>
      %cst_35 = arith.constant dense<0.000000e+00> : vector<8x32xf32>
      %76 = tpu.matmul %75, %72, %cst_35 {dimension_numbers = #tpu.dot_dimension_numbers<[0], [0], [1], [1], [0, 1, 1, 1], [], []>} : vector<8x8xbf16>, vector<8x32xbf16>, vector<8x32xf32> -> vector<8x32xf32>
      %c0_36 = arith.constant 0 : index
      %c0_37 = arith.constant 0 : index
      %c32_38 = arith.constant 32 : index
      %77 = vector.load %arg7[%c0_36, %c0_37, %c32_38] : memref<1x16x128xf32, #tpu.memory_space<vmem>>, vector<1x8x32xf32>
      %78 = vector.shape_cast %77 : vector<1x8x32xf32> to vector<8x32xf32>
      %79 = arith.addf %78, %74 : vector<8x32xf32>
      %c0_39 = arith.constant 0 : index
      %c0_40 = arith.constant 0 : index
      %c32_41 = arith.constant 32 : index
      %80 = vector.load %arg7[%c0_39, %c0_40, %c32_41] : memref<1x16x128xf32, #tpu.memory_space<vmem>>, vector<1x8x32xf32>
      %81 = vector.shape_cast %80 : vector<1x8x32xf32> to vector<8x32xf32>
      %82 = vector.shape_cast %79 : vector<8x32xf32> to vector<1x8x32xf32>
      tpu.vector_store %arg7[%c0_39, %c0_40, %c32_41], %82 {strides = array<i32>} : memref<1x16x128xf32, #tpu.memory_space<vmem>>, vector<1x8x32xf32>,
      %c0_42 = arith.constant 0 : index
      %c8_43 = arith.constant 8 : index
      %c32_44 = arith.constant 32 : index
      %83 = vector.load %arg7[%c0_42, %c8_43, %c32_44] : memref<1x16x128xf32, #tpu.memory_space<vmem>>, vector<1x8x32xf32>
      %84 = vector.shape_cast %83 : vector<1x8x32xf32> to vector<8x32xf32>
      %85 = arith.addf %84, %76 : vector<8x32xf32>
      %c0_45 = arith.constant 0 : index
      %c8_46 = arith.constant 8 : index
      %c32_47 = arith.constant 32 : index
      %86 = vector.load %arg7[%c0_45, %c8_46, %c32_47] : memref<1x16x128xf32, #tpu.memory_space<vmem>>, vector<1x8x32xf32>
      %87 = vector.shape_cast %86 : vector<1x8x32xf32> to vector<8x32xf32>
      %88 = vector.shape_cast %85 : vector<8x32xf32> to vector<1x8x32xf32>
      tpu.vector_store %arg7[%c0_45, %c8_46, %c32_47], %88 {strides = array<i32>} : memref<1x16x128xf32, #tpu.memory_space<vmem>>, vector<1x8x32xf32>,
      %89 = vector.extract_strided_slice %34 {offsets = [0, 64], sizes = [8, 32], strides = [1, 1]} : vector<8x128xbf16> to vector<8x32xbf16>
      %90 = vector.extract_strided_slice %36 {offsets = [0, 16], sizes = [8, 8], strides = [1, 1]} : vector<8x32xbf16> to vector<8x8xbf16>
      %cst_48 = arith.constant dense<0.000000e+00> : vector<8x32xf32>
      %91 = tpu.matmul %90, %89, %cst_48 {dimension_numbers = #tpu.dot_dimension_numbers<[0], [0], [1], [1], [0, 1, 1, 1], [], []>} : vector<8x8xbf16>, vector<8x32xbf16>, vector<8x32xf32> -> vector<8x32xf32>
      %92 = vector.extract_strided_slice %38 {offsets = [0, 16], sizes = [8, 8], strides = [1, 1]} : vector<8x32xbf16> to vector<8x8xbf16>
      %cst_49 = arith.constant dense<0.000000e+00> : vector<8x32xf32>
      %93 = tpu.matmul %92, %89, %cst_49 {dimension_numbers = #tpu.dot_dimension_numbers<[0], [0], [1], [1], [0, 1, 1, 1], [], []>} : vector<8x8xbf16>, vector<8x32xbf16>, vector<8x32xf32> -> vector<8x32xf32>
      %c0_50 = arith.constant 0 : index
      %c0_51 = arith.constant 0 : index
      %c64 = arith.constant 64 : index
      %94 = vector.load %arg7[%c0_50, %c0_51, %c64] : memref<1x16x128xf32, #tpu.memory_space<vmem>>, vector<1x8x32xf32>
      %95 = vector.shape_cast %94 : vector<1x8x32xf32> to vector<8x32xf32>
      %96 = arith.addf %95, %91 : vector<8x32xf32>
      %c0_52 = arith.constant 0 : index
      %c0_53 = arith.constant 0 : index
      %c64_54 = arith.constant 64 : index
      %97 = vector.load %arg7[%c0_52, %c0_53, %c64_54] : memref<1x16x128xf32, #tpu.memory_space<vmem>>, vector<1x8x32xf32>
      %98 = vector.shape_cast %97 : vector<1x8x32xf32> to vector<8x32xf32>
      %99 = vector.shape_cast %96 : vector<8x32xf32> to vector<1x8x32xf32>
      tpu.vector_store %arg7[%c0_52, %c0_53, %c64_54], %99 {strides = array<i32>} : memref<1x16x128xf32, #tpu.memory_space<vmem>>, vector<1x8x32xf32>,
      %c0_55 = arith.constant 0 : index
      %c8_56 = arith.constant 8 : index
      %c64_57 = arith.constant 64 : index
      %100 = vector.load %arg7[%c0_55, %c8_56, %c64_57] : memref<1x16x128xf32, #tpu.memory_space<vmem>>, vector<1x8x32xf32>
      %101 = vector.shape_cast %100 : vector<1x8x32xf32> to vector<8x32xf32>
      %102 = arith.addf %101, %93 : vector<8x32xf32>
      %c0_58 = arith.constant 0 : index
      %c8_59 = arith.constant 8 : index
      %c64_60 = arith.constant 64 : index
      %103 = vector.load %arg7[%c0_58, %c8_59, %c64_60] : memref<1x16x128xf32, #tpu.memory_space<vmem>>, vector<1x8x32xf32>
      %104 = vector.shape_cast %103 : vector<1x8x32xf32> to vector<8x32xf32>
      %105 = vector.shape_cast %102 : vector<8x32xf32> to vector<1x8x32xf32>
      tpu.vector_store %arg7[%c0_58, %c8_59, %c64_60], %105 {strides = array<i32>} : memref<1x16x128xf32, #tpu.memory_space<vmem>>, vector<1x8x32xf32>,
      %106 = vector.extract_strided_slice %34 {offsets = [0, 96], sizes = [8, 32], strides = [1, 1]} : vector<8x128xbf16> to vector<8x32xbf16>
      %107 = vector.extract_strided_slice %36 {offsets = [0, 24], sizes = [8, 8], strides = [1, 1]} : vector<8x32xbf16> to vector<8x8xbf16>
      %cst_61 = arith.constant dense<0.000000e+00> : vector<8x32xf32>
      %108 = tpu.matmul %107, %106, %cst_61 {dimension_numbers = #tpu.dot_dimension_numbers<[0], [0], [1], [1], [0, 1, 1, 1], [], []>} : vector<8x8xbf16>, vector<8x32xbf16>, vector<8x32xf32> -> vector<8x32xf32>
      %109 = vector.extract_strided_slice %38 {offsets = [0, 24], sizes = [8, 8], strides = [1, 1]} : vector<8x32xbf16> to vector<8x8xbf16>
      %cst_62 = arith.constant dense<0.000000e+00> : vector<8x32xf32>
      %110 = tpu.matmul %109, %106, %cst_62 {dimension_numbers = #tpu.dot_dimension_numbers<[0], [0], [1], [1], [0, 1, 1, 1], [], []>} : vector<8x8xbf16>, vector<8x32xbf16>, vector<8x32xf32> -> vector<8x32xf32>
      %c0_63 = arith.constant 0 : index
      %c0_64 = arith.constant 0 : index
      %c96 = arith.constant 96 : index
      %111 = vector.load %arg7[%c0_63, %c0_64, %c96] : memref<1x16x128xf32, #tpu.memory_space<vmem>>, vector<1x8x32xf32>
      %112 = vector.shape_cast %111 : vector<1x8x32xf32> to vector<8x32xf32>
      %113 = arith.addf %112, %108 : vector<8x32xf32>
      %c0_65 = arith.constant 0 : index
      %c0_66 = arith.constant 0 : index
      %c96_67 = arith.constant 96 : index
      %114 = vector.load %arg7[%c0_65, %c0_66, %c96_67] : memref<1x16x128xf32, #tpu.memory_space<vmem>>, vector<1x8x32xf32>
      %115 = vector.shape_cast %114 : vector<1x8x32xf32> to vector<8x32xf32>
      %116 = vector.shape_cast %113 : vector<8x32xf32> to vector<1x8x32xf32>
      tpu.vector_store %arg7[%c0_65, %c0_66, %c96_67], %116 {strides = array<i32>} : memref<1x16x128xf32, #tpu.memory_space<vmem>>, vector<1x8x32xf32>,
      %c0_68 = arith.constant 0 : index
      %c8_69 = arith.constant 8 : index
      %c96_70 = arith.constant 96 : index
      %117 = vector.load %arg7[%c0_68, %c8_69, %c96_70] : memref<1x16x128xf32, #tpu.memory_space<vmem>>, vector<1x8x32xf32>
      %118 = vector.shape_cast %117 : vector<1x8x32xf32> to vector<8x32xf32>
      %119 = arith.addf %118, %110 : vector<8x32xf32>
      %c0_71 = arith.constant 0 : index
      %c8_72 = arith.constant 8 : index
      %c96_73 = arith.constant 96 : index
      %120 = vector.load %arg7[%c0_71, %c8_72, %c96_73] : memref<1x16x128xf32, #tpu.memory_space<vmem>>, vector<1x8x32xf32>
      %121 = vector.shape_cast %120 : vector<1x8x32xf32> to vector<8x32xf32>
      %122 = vector.shape_cast %119 : vector<8x32xf32> to vector<1x8x32xf32>
      tpu.vector_store %arg7[%c0_71, %c8_72, %c96_73], %122 {strides = array<i32>} : memref<1x16x128xf32, #tpu.memory_space<vmem>>, vector<1x8x32xf32>,
    } else {
    }
    %c1_i32 = arith.constant 1 : i32
    %11 = arith.cmpi eq, %arg2, %c1_i32 : i32
    %12 = arith.extui %11 : i1 to i32
    %c0_i32_2 = arith.constant 0 : i32
    %13 = arith.cmpi ne, %12, %c0_i32_2 : i32
    scf.if %13 {
      %c0 = arith.constant 0 : index
      %c0_3 = arith.constant 0 : index
      %c0_4 = arith.constant 0 : index
      %14 = vector.load %arg7[%c0, %c0_3, %c0_4] : memref<1x16x128xf32, #tpu.memory_space<vmem>>, vector<1x16x128xf32>
      %15 = vector.shape_cast %14 : vector<1x16x128xf32> to vector<16x128xf32>
      %cst = arith.constant 0.353553385 : f32
      %16 = vector.broadcast %cst : f32 to vector<16x128xf32>
      %17 = arith.mulf %15, %16 : vector<16x128xf32>
      %c0_5 = arith.constant 0 : index
      %c0_6 = arith.constant 0 : index
      %c0_7 = arith.constant 0 : index
      %18 = vector.load %arg7[%c0_5, %c0_6, %c0_7] : memref<1x16x128xf32, #tpu.memory_space<vmem>>, vector<1x16x128xf32>
      %19 = vector.shape_cast %18 : vector<1x16x128xf32> to vector<16x128xf32>
      %20 = vector.shape_cast %17 : vector<16x128xf32> to vector<1x16x128xf32>
      tpu.vector_store %arg7[%c0_5, %c0_6, %c0_7], %20 {strides = array<i32>} : memref<1x16x128xf32, #tpu.memory_space<vmem>>, vector<1x16x128xf32>,
      %c0_8 = arith.constant 0 : index
      %c0_9 = arith.constant 0 : index
      %c0_10 = arith.constant 0 : index
      %21 = vector.load %arg8[%c0_8, %c0_9, %c0_10] : memref<1x1x64xf32, #tpu.memory_space<vmem>>, vector<1x1x64xf32>
      %22 = vector.shape_cast %21 : vector<1x1x64xf32> to vector<1x64xf32>
      %cst_11 = arith.constant 0.353553385 : f32
      %23 = vector.broadcast %cst_11 : f32 to vector<1x64xf32>
      %24 = arith.mulf %22, %23 : vector<1x64xf32>
      %c0_12 = arith.constant 0 : index
      %c0_13 = arith.constant 0 : index
      %c0_14 = arith.constant 0 : index
      %25 = vector.load %arg8[%c0_12, %c0_13, %c0_14] : memref<1x1x64xf32, #tpu.memory_space<vmem>>, vector<1x1x64xf32>
      %26 = vector.shape_cast %25 : vector<1x1x64xf32> to vector<1x64xf32>
      %27 = vector.shape_cast %24 : vector<1x64xf32> to vector<1x1x64xf32>
      tpu.vector_store %arg8[%c0_12, %c0_13, %c0_14], %27 {strides = array<i32>} : memref<1x1x64xf32, #tpu.memory_space<vmem>>, vector<1x1x64xf32>,
    } else {
    }
    return
  }
  func.func @transform_0(%arg0: i32, %arg1: i32, %arg2: i32, %arg3: memref<2xi32, #tpu.memory_space<smem>>) -> (i32, i32) {
    %c2_i32 = arith.constant 2 : i32
    %0 = arith.muli %arg1, %c2_i32 : i32
    %1 = arith.addi %0, %arg2 : i32
    %c0_i32 = arith.constant 0 : i32
    return %1, %arg0 : i32, i32
  }
  func.func @transform_1(%arg0: i32, %arg1: i32, %arg2: i32, %arg3: memref<2xi32, #tpu.memory_space<smem>>) -> (i32, i32) {
    %c0_i32 = arith.constant 0 : i32
    %c0_i32_0 = arith.constant 0 : i32
    %c0_i32_1 = arith.constant 0 : i32
    return %c0_i32, %c0_i32_0 : i32, i32
  }
  func.func @transform_2(%arg0: i32, %arg1: i32, %arg2: i32, %arg3: memref<2xi32, #tpu.memory_space<smem>>) -> (i32, i32) {
    %c0_i32 = arith.constant 0 : i32
    %c0_i32_0 = arith.constant 0 : i32
    %c0_i32_1 = arith.constant 0 : i32
    return %c0_i32, %c0_i32_0 : i32, i32
  }
  func.func @transform_3(%arg0: i32, %arg1: i32, %arg2: i32, %arg3: memref<2xi32, #tpu.memory_space<smem>>) -> (i32, i32, i32) {
    %c2_i32 = arith.constant 2 : i32
    %0 = arith.muli %arg0, %c2_i32 : i32
    %1 = arith.addi %0, %arg1 : i32
    %c0_i32 = arith.constant 0 : i32
    %c0_i32_0 = arith.constant 0 : i32
    %c0_i32_1 = arith.constant 0 : i32
    return %1, %c0_i32, %c0_i32_0 : i32, i32, i32
  }
  func.func @transform_4(%arg0: i32, %arg1: i32, %arg2: i32, %arg3: memref<2xi32, #tpu.memory_space<smem>>) -> (i32, i32, i32) {
    %c2_i32 = arith.constant 2 : i32
    %0 = arith.muli %arg0, %c2_i32 : i32
    %1 = arith.addi %0, %arg1 : i32
    %c0_i32 = arith.constant 0 : i32
    %c0_i32_0 = arith.constant 0 : i32
    %c0_i32_1 = arith.constant 0 : i32
    return %1, %c0_i32, %c0_i32_0 : i32, i32, i32
  }
}

module attributes {stable_mosaic.version = 11 : i64} {
  func.func @_cross_attn_project_kernel(%arg0: i32, %arg1: i32, %arg2: i32, %arg3: memref<2xi32, #tpu.memory_space<smem>>, %arg4: memref<8x128xf32, #tpu.memory_space<vmem>>, %arg5: memref<128x160xbf16, #tpu.memory_space<vmem>>, %arg6: memref<1x160xf32, #tpu.memory_space<vmem>>, %arg7: memref<1x16x128xf32, #tpu.memory_space<vmem>>, %arg8: memref<1x1x64xf32, #tpu.memory_space<vmem>>) attributes {dimension_semantics = [#tpu.dimension_semantics<parallel>, #tpu.dimension_semantics<parallel>, #tpu.dimension_semantics<arbitrary>], iteration_bounds = array<i64: 2, 2, 2>, scalar_prefetch = 1 : i64, scratch_operands = 0 : i64, tpu.core_type = #tpu.core_type<tc>, window_params = [{transform_indices = @transform_0, window_bounds = array<i64: 8, 128>}, {pipeline_mode = #tpu.pipeline_mode<synchronous>, transform_indices = @transform_1, window_bounds = array<i64: 128, 160>}, {pipeline_mode = #tpu.pipeline_mode<synchronous>, transform_indices = @transform_2, window_bounds = array<i64: 1, 160>}, {transform_indices = @transform_3, window_bounds = array<i64: 1, 16, 128>}, {transform_indices = @transform_4, window_bounds = array<i64: 1, 1, 64>}]} {
    %c0_i32 = arith.constant 0 : i32
    %0 = arith.cmpi eq, %arg2, %c0_i32 : i32
    %1 = arith.extui %0 : i1 to i32
    %c0_i32_0 = arith.constant 0 : i32
    %2 = arith.cmpi ne, %1, %c0_i32_0 : i32
    scf.if %2 {
      %cst = arith.constant 0.000000e+00 : f32
      %14 = vector.broadcast %cst : f32 to vector<16x128xf32>
      %c0 = arith.constant 0 : index
      %c0_3 = arith.constant 0 : index
      %c0_4 = arith.constant 0 : index
      %15 = vector.load %arg7[%c0, %c0_3, %c0_4] : memref<1x16x128xf32, #tpu.memory_space<vmem>>, vector<1x16x128xf32>
      %16 = vector.shape_cast %15 : vector<1x16x128xf32> to vector<16x128xf32>
      %17 = vector.shape_cast %14 : vector<16x128xf32> to vector<1x16x128xf32>
      tpu.vector_store %arg7[%c0, %c0_3, %c0_4], %17 {strides = array<i32>} : memref<1x16x128xf32, #tpu.memory_space<vmem>>, vector<1x16x128xf32>,
      %cst_5 = arith.constant 0.000000e+00 : f32
      %18 = vector.broadcast %cst_5 : f32 to vector<1x64xf32>
      %c0_6 = arith.constant 0 : index
      %c0_7 = arith.constant 0 : index
      %c0_8 = arith.constant 0 : index
      %19 = vector.load %arg8[%c0_6, %c0_7, %c0_8] : memref<1x1x64xf32, #tpu.memory_space<vmem>>, vector<1x1x64xf32>
      %20 = vector.shape_cast %19 : vector<1x1x64xf32> to vector<1x64xf32>
      %21 = vector.shape_cast %18 : vector<1x64xf32> to vector<1x1x64xf32>
      tpu.vector_store %arg8[%c0_6, %c0_7, %c0_8], %21 {strides = array<i32>} : memref<1x1x64xf32, #tpu.memory_space<vmem>>, vector<1x1x64xf32>,
    } else {
    }
    %3 = arith.index_cast %arg0 : i32 to index
    %4 = memref.load %arg3[%3] : memref<2xi32, #tpu.memory_space<smem>>
    %c2_i32 = arith.constant 2 : i32
    %5 = arith.muli %arg1, %c2_i32 : i32
    %6 = arith.addi %5, %arg2 : i32
    %c8_i32 = arith.constant 8 : i32
    %7 = arith.muli %6, %c8_i32 : i32
    %8 = arith.cmpi slt, %7, %4 : i32
    %9 = arith.extui %8 : i1 to i32
    %c0_i32_1 = arith.constant 0 : i32
    %10 = arith.cmpi ne, %9, %c0_i32_1 : i32
    scf.if %10 {
      %c0 = arith.constant 0 : index
      %c0_3 = arith.constant 0 : index
      %14 = vector.load %arg4[%c0, %c0_3] : memref<8x128xf32, #tpu.memory_space<vmem>>, vector<8x128xf32>
      %15 = arith.truncf %14 : vector<8x128xf32> to vector<8x128xbf16>
      %c0_4 = arith.constant 0 : index
      %c0_5 = arith.constant 0 : index
      %16 = vector.load %arg5[%c0_4, %c0_5] : memref<128x160xbf16, #tpu.memory_space<vmem>>, vector<128x160xbf16>
      %cst = arith.constant dense<0.000000e+00> : vector<8x160xf32>
      %17 = tpu.matmul %15, %16, %cst {dimension_numbers = #tpu.dot_dimension_numbers<[1], [0], [0], [1], [0, 0, 1, 1], [], []>} : vector<8x128xbf16>, vector<128x160xbf16>, vector<8x160xf32> -> vector<8x160xf32>
      %c0_6 = arith.constant 0 : index
      %c0_7 = arith.constant 0 : index
      %18 = vector.load %arg6[%c0_6, %c0_7] : memref<1x160xf32, #tpu.memory_space<vmem>>, vector<1x160xf32>
      %19 = vector.broadcast %18 : vector<1x160xf32> to vector<8x160xf32>
      %20 = arith.addf %17, %19 : vector<8x160xf32>
      %21 = vector.extract_strided_slice %20 {offsets = [0, 0], sizes = [8, 32], strides = [1, 1]} : vector<8x160xf32> to vector<8x32xf32>
      %22 = vector.extract_strided_slice %20 {offsets = [0, 32], sizes = [8, 128], strides = [1, 1]} : vector<8x160xf32> to vector<8x128xf32>
      %23 = tpu.iota {dimensions = array<i32: 0>} : vector<8x8xi32>
      %24 = vector.broadcast %7 : i32 to vector<8x8xi32>
      %25 = arith.addi %24, %23 : vector<8x8xi32>
      %26 = vector.broadcast %4 : i32 to vector<8x8xi32>
      %27 = arith.cmpi slt, %25, %26 : vector<8x8xi32>
      %28 = arith.extui %27 : vector<8x8xi1> to vector<8x8xi32>
      %29 = arith.sitofp %28 : vector<8x8xi32> to vector<8x8xf32>
      %30 = vector.extract_strided_slice %29 {offsets = [0, 0], sizes = [8, 1], strides = [1, 1]} : vector<8x8xf32> to vector<8x1xf32>
      %31 = arith.truncf %29 : vector<8x8xf32> to vector<8x8xbf16>
      %32 = vector.broadcast %30 : vector<8x1xf32> to vector<8x128xf32>
      %33 = arith.mulf %22, %32 : vector<8x128xf32>
      %34 = arith.truncf %33 : vector<8x128xf32> to vector<8x128xbf16>
      %35 = math.sin %21 : vector<8x32xf32>
      %36 = arith.truncf %35 : vector<8x32xf32> to vector<8x32xbf16>
      %37 = math.cos %21 : vector<8x32xf32>
      %38 = arith.truncf %37 : vector<8x32xf32> to vector<8x32xbf16>
      %cst_8 = arith.constant dense<0.000000e+00> : vector<8x32xf32>
      %39 = tpu.matmul %31, %36, %cst_8 {dimension_numbers = #tpu.dot_dimension_numbers<[0], [0], [1], [1], [0, 1, 1, 1], [], []>} : vector<8x8xbf16>, vector<8x32xbf16>, vector<8x32xf32> -> vector<8x32xf32>
      %40 = vector.extract_strided_slice %39 {offsets = [0, 0], sizes = [1, 32], strides = [1, 1]} : vector<8x32xf32> to vector<1x32xf32>
      %cst_9 = arith.constant dense<0.000000e+00> : vector<8x32xf32>
      %41 = tpu.matmul %31, %38, %cst_9 {dimension_numbers = #tpu.dot_dimension_numbers<[0], [0], [1], [1], [0, 1, 1, 1], [], []>} : vector<8x8xbf16>, vector<8x32xbf16>, vector<8x32xf32> -> vector<8x32xf32>
      %42 = vector.extract_strided_slice %41 {offsets = [0, 0], sizes = [1, 32], strides = [1, 1]} : vector<8x32xf32> to vector<1x32xf32>
      %c0_10 = arith.constant 0 : index
      %c0_11 = arith.constant 0 : index
      %c0_12 = arith.constant 0 : index
      %43 = vector.load %arg8[%c0_10, %c0_11, %c0_12] : memref<1x1x64xf32, #tpu.memory_space<vmem>>, vector<1x1x32xf32>
      %44 = vector.shape_cast %43 : vector<1x1x32xf32> to vector<1x32xf32>
      %45 = arith.addf %44, %40 : vector<1x32xf32>
      %c0_13 = arith.constant 0 : index
      %c0_14 = arith.constant 0 : index
      %c0_15 = arith.constant 0 : index
      %46 = vector.load %arg8[%c0_13, %c0_14, %c0_15] : memref<1x1x64xf32, #tpu.memory_space<vmem>>, vector<1x1x32xf32>
      %47 = vector.shape_cast %46 : vector<1x1x32xf32> to vector<1x32xf32>
      %48 = vector.shape_cast %45 : vector<1x32xf32> to vector<1x1x32xf32>
      tpu.vector_store %arg8[%c0_13, %c0_14, %c0_15], %48 {strides = array<i32>} : memref<1x1x64xf32, #tpu.memory_space<vmem>>, vector<1x1x32xf32>,
      %c0_16 = arith.constant 0 : index
      %c0_17 = arith.constant 0 : index
      %c32 = arith.constant 32 : index
      %49 = vector.load %arg8[%c0_16, %c0_17, %c32] : memref<1x1x64xf32, #tpu.memory_space<vmem>>, vector<1x1x32xf32>
      %50 = vector.shape_cast %49 : vector<1x1x32xf32> to vector<1x32xf32>
      %51 = arith.addf %50, %42 : vector<1x32xf32>
      %c0_18 = arith.constant 0 : index
      %c0_19 = arith.constant 0 : index
      %c32_20 = arith.constant 32 : index
      %52 = vector.load %arg8[%c0_18, %c0_19, %c32_20] : memref<1x1x64xf32, #tpu.memory_space<vmem>>, vector<1x1x32xf32>
      %53 = vector.shape_cast %52 : vector<1x1x32xf32> to vector<1x32xf32>
      %54 = vector.shape_cast %51 : vector<1x32xf32> to vector<1x1x32xf32>
      tpu.vector_store %arg8[%c0_18, %c0_19, %c32_20], %54 {strides = array<i32>} : memref<1x1x64xf32, #tpu.memory_space<vmem>>, vector<1x1x32xf32>,
      %55 = vector.extract_strided_slice %34 {offsets = [0, 0], sizes = [8, 32], strides = [1, 1]} : vector<8x128xbf16> to vector<8x32xbf16>
      %56 = vector.extract_strided_slice %36 {offsets = [0, 0], sizes = [8, 8], strides = [1, 1]} : vector<8x32xbf16> to vector<8x8xbf16>
      %cst_21 = arith.constant dense<0.000000e+00> : vector<8x32xf32>
      %57 = tpu.matmul %56, %55, %cst_21 {dimension_numbers = #tpu.dot_dimension_numbers<[0], [0], [1], [1], [0, 1, 1, 1], [], []>} : vector<8x8xbf16>, vector<8x32xbf16>, vector<8x32xf32> -> vector<8x32xf32>
      %58 = vector.extract_strided_slice %38 {offsets = [0, 0], sizes = [8, 8], strides = [1, 1]} : vector<8x32xbf16> to vector<8x8xbf16>
      %cst_22 = arith.constant dense<0.000000e+00> : vector<8x32xf32>
      %59 = tpu.matmul %58, %55, %cst_22 {dimension_numbers = #tpu.dot_dimension_numbers<[0], [0], [1], [1], [0, 1, 1, 1], [], []>} : vector<8x8xbf16>, vector<8x32xbf16>, vector<8x32xf32> -> vector<8x32xf32>
      %c0_23 = arith.constant 0 : index
      %c0_24 = arith.constant 0 : index
      %c0_25 = arith.constant 0 : index
      %60 = vector.load %arg7[%c0_23, %c0_24, %c0_25] : memref<1x16x128xf32, #tpu.memory_space<vmem>>, vector<1x8x32xf32>
      %61 = vector.shape_cast %60 : vector<1x8x32xf32> to vector<8x32xf32>
      %62 = arith.addf %61, %57 : vector<8x32xf32>
      %c0_26 = arith.constant 0 : index
      %c0_27 = arith.constant 0 : index
      %c0_28 = arith.constant 0 : index
      %63 = vector.load %arg7[%c0_26, %c0_27, %c0_28] : memref<1x16x128xf32, #tpu.memory_space<vmem>>, vector<1x8x32xf32>
      %64 = vector.shape_cast %63 : vector<1x8x32xf32> to vector<8x32xf32>
      %65 = vector.shape_cast %62 : vector<8x32xf32> to vector<1x8x32xf32>
      tpu.vector_store %arg7[%c0_26, %c0_27, %c0_28], %65 {strides = array<i32>} : memref<1x16x128xf32, #tpu.memory_space<vmem>>, vector<1x8x32xf32>,
      %c0_29 = arith.constant 0 : index
      %c8 = arith.constant 8 : index
      %c0_30 = arith.constant 0 : index
      %66 = vector.load %arg7[%c0_29, %c8, %c0_30] : memref<1x16x128xf32, #tpu.memory_space<vmem>>, vector<1x8x32xf32>
      %67 = vector.shape_cast %66 : vector<1x8x32xf32> to vector<8x32xf32>
      %68 = arith.addf %67, %59 : vector<8x32xf32>
      %c0_31 = arith.constant 0 : index
      %c8_32 = arith.constant 8 : index
      %c0_33 = arith.constant 0 : index
      %69 = vector.load %arg7[%c0_31, %c8_32, %c0_33] : memref<1x16x128xf32, #tpu.memory_space<vmem>>, vector<1x8x32xf32>
      %70 = vector.shape_cast %69 : vector<1x8x32xf32> to vector<8x32xf32>
      %71 = vector.shape_cast %68 : vector<8x32xf32> to vector<1x8x32xf32>
      tpu.vector_store %arg7[%c0_31, %c8_32, %c0_33], %71 {strides = array<i32>} : memref<1x16x128xf32, #tpu.memory_space<vmem>>, vector<1x8x32xf32>,
      %72 = vector.extract_strided_slice %34 {offsets = [0, 32], sizes = [8, 32], strides = [1, 1]} : vector<8x128xbf16> to vector<8x32xbf16>
      %73 = vector.extract_strided_slice %36 {offsets = [0, 8], sizes = [8, 8], strides = [1, 1]} : vector<8x32xbf16> to vector<8x8xbf16>
      %cst_34 = arith.constant dense<0.000000e+00> : vector<8x32xf32>
      %74 = tpu.matmul %73, %72, %cst_34 {dimension_numbers = #tpu.dot_dimension_numbers<[0], [0], [1], [1], [0, 1, 1, 1], [], []>} : vector<8x8xbf16>, vector<8x32xbf16>, vector<8x32xf32> -> vector<8x32xf32>
      %75 = vector.extract_strided_slice %38 {offsets = [0, 8], sizes = [8, 8], strides = [1, 1]} : vector<8x32xbf16> to vector<8x8xbf16>
      %cst_35 = arith.constant dense<0.000000e+00> : vector<8x32xf32>
      %76 = tpu.matmul %75, %72, %cst_35 {dimension_numbers = #tpu.dot_dimension_numbers<[0], [0], [1], [1], [0, 1, 1, 1], [], []>} : vector<8x8xbf16>, vector<8x32xbf16>, vector<8x32xf32> -> vector<8x32xf32>
      %c0_36 = arith.constant 0 : index
      %c0_37 = arith.constant 0 : index
      %c32_38 = arith.constant 32 : index
      %77 = vector.load %arg7[%c0_36, %c0_37, %c32_38] : memref<1x16x128xf32, #tpu.memory_space<vmem>>, vector<1x8x32xf32>
      %78 = vector.shape_cast %77 : vector<1x8x32xf32> to vector<8x32xf32>
      %79 = arith.addf %78, %74 : vector<8x32xf32>
      %c0_39 = arith.constant 0 : index
      %c0_40 = arith.constant 0 : index
      %c32_41 = arith.constant 32 : index
      %80 = vector.load %arg7[%c0_39, %c0_40, %c32_41] : memref<1x16x128xf32, #tpu.memory_space<vmem>>, vector<1x8x32xf32>
      %81 = vector.shape_cast %80 : vector<1x8x32xf32> to vector<8x32xf32>
      %82 = vector.shape_cast %79 : vector<8x32xf32> to vector<1x8x32xf32>
      tpu.vector_store %arg7[%c0_39, %c0_40, %c32_41], %82 {strides = array<i32>} : memref<1x16x128xf32, #tpu.memory_space<vmem>>, vector<1x8x32xf32>,
      %c0_42 = arith.constant 0 : index
      %c8_43 = arith.constant 8 : index
      %c32_44 = arith.constant 32 : index
      %83 = vector.load %arg7[%c0_42, %c8_43, %c32_44] : memref<1x16x128xf32, #tpu.memory_space<vmem>>, vector<1x8x32xf32>
      %84 = vector.shape_cast %83 : vector<1x8x32xf32> to vector<8x32xf32>
      %85 = arith.addf %84, %76 : vector<8x32xf32>
      %c0_45 = arith.constant 0 : index
      %c8_46 = arith.constant 8 : index
      %c32_47 = arith.constant 32 : index
      %86 = vector.load %arg7[%c0_45, %c8_46, %c32_47] : memref<1x16x128xf32, #tpu.memory_space<vmem>>, vector<1x8x32xf32>
      %87 = vector.shape_cast %86 : vector<1x8x32xf32> to vector<8x32xf32>
      %88 = vector.shape_cast %85 : vector<8x32xf32> to vector<1x8x32xf32>
      tpu.vector_store %arg7[%c0_45, %c8_46, %c32_47], %88 {strides = array<i32>} : memref<1x16x128xf32, #tpu.memory_space<vmem>>, vector<1x8x32xf32>,
      %89 = vector.extract_strided_slice %34 {offsets = [0, 64], sizes = [8, 32], strides = [1, 1]} : vector<8x128xbf16> to vector<8x32xbf16>
      %90 = vector.extract_strided_slice %36 {offsets = [0, 16], sizes = [8, 8], strides = [1, 1]} : vector<8x32xbf16> to vector<8x8xbf16>
      %cst_48 = arith.constant dense<0.000000e+00> : vector<8x32xf32>
      %91 = tpu.matmul %90, %89, %cst_48 {dimension_numbers = #tpu.dot_dimension_numbers<[0], [0], [1], [1], [0, 1, 1, 1], [], []>} : vector<8x8xbf16>, vector<8x32xbf16>, vector<8x32xf32> -> vector<8x32xf32>
      %92 = vector.extract_strided_slice %38 {offsets = [0, 16], sizes = [8, 8], strides = [1, 1]} : vector<8x32xbf16> to vector<8x8xbf16>
      %cst_49 = arith.constant dense<0.000000e+00> : vector<8x32xf32>
      %93 = tpu.matmul %92, %89, %cst_49 {dimension_numbers = #tpu.dot_dimension_numbers<[0], [0], [1], [1], [0, 1, 1, 1], [], []>} : vector<8x8xbf16>, vector<8x32xbf16>, vector<8x32xf32> -> vector<8x32xf32>
      %c0_50 = arith.constant 0 : index
      %c0_51 = arith.constant 0 : index
      %c64 = arith.constant 64 : index
      %94 = vector.load %arg7[%c0_50, %c0_51, %c64] : memref<1x16x128xf32, #tpu.memory_space<vmem>>, vector<1x8x32xf32>
      %95 = vector.shape_cast %94 : vector<1x8x32xf32> to vector<8x32xf32>
      %96 = arith.addf %95, %91 : vector<8x32xf32>
      %c0_52 = arith.constant 0 : index
      %c0_53 = arith.constant 0 : index
      %c64_54 = arith.constant 64 : index
      %97 = vector.load %arg7[%c0_52, %c0_53, %c64_54] : memref<1x16x128xf32, #tpu.memory_space<vmem>>, vector<1x8x32xf32>
      %98 = vector.shape_cast %97 : vector<1x8x32xf32> to vector<8x32xf32>
      %99 = vector.shape_cast %96 : vector<8x32xf32> to vector<1x8x32xf32>
      tpu.vector_store %arg7[%c0_52, %c0_53, %c64_54], %99 {strides = array<i32>} : memref<1x16x128xf32, #tpu.memory_space<vmem>>, vector<1x8x32xf32>,
      %c0_55 = arith.constant 0 : index
      %c8_56 = arith.constant 8 : index
      %c64_57 = arith.constant 64 : index
      %100 = vector.load %arg7[%c0_55, %c8_56, %c64_57] : memref<1x16x128xf32, #tpu.memory_space<vmem>>, vector<1x8x32xf32>
      %101 = vector.shape_cast %100 : vector<1x8x32xf32> to vector<8x32xf32>
      %102 = arith.addf %101, %93 : vector<8x32xf32>
      %c0_58 = arith.constant 0 : index
      %c8_59 = arith.constant 8 : index
      %c64_60 = arith.constant 64 : index
      %103 = vector.load %arg7[%c0_58, %c8_59, %c64_60] : memref<1x16x128xf32, #tpu.memory_space<vmem>>, vector<1x8x32xf32>
      %104 = vector.shape_cast %103 : vector<1x8x32xf32> to vector<8x32xf32>
      %105 = vector.shape_cast %102 : vector<8x32xf32> to vector<1x8x32xf32>
      tpu.vector_store %arg7[%c0_58, %c8_59, %c64_60], %105 {strides = array<i32>} : memref<1x16x128xf32, #tpu.memory_space<vmem>>, vector<1x8x32xf32>,
      %106 = vector.extract_strided_slice %34 {offsets = [0, 96], sizes = [8, 32], strides = [1, 1]} : vector<8x128xbf16> to vector<8x32xbf16>
      %107 = vector.extract_strided_slice %36 {offsets = [0, 24], sizes = [8, 8], strides = [1, 1]} : vector<8x32xbf16> to vector<8x8xbf16>
      %cst_61 = arith.constant dense<0.000000e+00> : vector<8x32xf32>
      %108 = tpu.matmul %107, %106, %cst_61 {dimension_numbers = #tpu.dot_dimension_numbers<[0], [0], [1], [1], [0, 1, 1, 1], [], []>} : vector<8x8xbf16>, vector<8x32xbf16>, vector<8x32xf32> -> vector<8x32xf32>
      %109 = vector.extract_strided_slice %38 {offsets = [0, 24], sizes = [8, 8], strides = [1, 1]} : vector<8x32xbf16> to vector<8x8xbf16>
      %cst_62 = arith.constant dense<0.000000e+00> : vector<8x32xf32>
      %110 = tpu.matmul %109, %106, %cst_62 {dimension_numbers = #tpu.dot_dimension_numbers<[0], [0], [1], [1], [0, 1, 1, 1], [], []>} : vector<8x8xbf16>, vector<8x32xbf16>, vector<8x32xf32> -> vector<8x32xf32>
      %c0_63 = arith.constant 0 : index
      %c0_64 = arith.constant 0 : index
      %c96 = arith.constant 96 : index
      %111 = vector.load %arg7[%c0_63, %c0_64, %c96] : memref<1x16x128xf32, #tpu.memory_space<vmem>>, vector<1x8x32xf32>
      %112 = vector.shape_cast %111 : vector<1x8x32xf32> to vector<8x32xf32>
      %113 = arith.addf %112, %108 : vector<8x32xf32>
      %c0_65 = arith.constant 0 : index
      %c0_66 = arith.constant 0 : index
      %c96_67 = arith.constant 96 : index
      %114 = vector.load %arg7[%c0_65, %c0_66, %c96_67] : memref<1x16x128xf32, #tpu.memory_space<vmem>>, vector<1x8x32xf32>
      %115 = vector.shape_cast %114 : vector<1x8x32xf32> to vector<8x32xf32>
      %116 = vector.shape_cast %113 : vector<8x32xf32> to vector<1x8x32xf32>
      tpu.vector_store %arg7[%c0_65, %c0_66, %c96_67], %116 {strides = array<i32>} : memref<1x16x128xf32, #tpu.memory_space<vmem>>, vector<1x8x32xf32>,
      %c0_68 = arith.constant 0 : index
      %c8_69 = arith.constant 8 : index
      %c96_70 = arith.constant 96 : index
      %117 = vector.load %arg7[%c0_68, %c8_69, %c96_70] : memref<1x16x128xf32, #tpu.memory_space<vmem>>, vector<1x8x32xf32>
      %118 = vector.shape_cast %117 : vector<1x8x32xf32> to vector<8x32xf32>
      %119 = arith.addf %118, %110 : vector<8x32xf32>
      %c0_71 = arith.constant 0 : index
      %c8_72 = arith.constant 8 : index
      %c96_73 = arith.constant 96 : index
      %120 = vector.load %arg7[%c0_71, %c8_72, %c96_73] : memref<1x16x128xf32, #tpu.memory_space<vmem>>, vector<1x8x32xf32>
      %121 = vector.shape_cast %120 : vector<1x8x32xf32> to vector<8x32xf32>
      %122 = vector.shape_cast %119 : vector<8x32xf32> to vector<1x8x32xf32>
      tpu.vector_store %arg7[%c0_71, %c8_72, %c96_73], %122 {strides = array<i32>} : memref<1x16x128xf32, #tpu.memory_space<vmem>>, vector<1x8x32xf32>,
    } else {
    }
    %c1_i32 = arith.constant 1 : i32
    %11 = arith.cmpi eq, %arg2, %c1_i32 : i32
    %12 = arith.extui %11 : i1 to i32
    %c0_i32_2 = arith.constant 0 : i32
    %13 = arith.cmpi ne, %12, %c0_i32_2 : i32
    scf.if %13 {
      %c0 = arith.constant 0 : index
      %c0_3 = arith.constant 0 : index
      %c0_4 = arith.constant 0 : index
      %14 = vector.load %arg7[%c0, %c0_3, %c0_4] : memref<1x16x128xf32, #tpu.memory_space<vmem>>, vector<1x16x128xf32>
      %15 = vector.shape_cast %14 : vector<1x16x128xf32> to vector<16x128xf32>
      %cst = arith.constant 0.353553385 : f32
      %16 = vector.broadcast %cst : f32 to vector<16x128xf32>
      %17 = arith.mulf %15, %16 : vector<16x128xf32>
      %c0_5 = arith.constant 0 : index
      %c0_6 = arith.constant 0 : index
      %c0_7 = arith.constant 0 : index
      %18 = vector.load %arg7[%c0_5, %c0_6, %c0_7] : memref<1x16x128xf32, #tpu.memory_space<vmem>>, vector<1x16x128xf32>
      %19 = vector.shape_cast %18 : vector<1x16x128xf32> to vector<16x128xf32>
      %20 = vector.shape_cast %17 : vector<16x128xf32> to vector<1x16x128xf32>
      tpu.vector_store %arg7[%c0_5, %c0_6, %c0_7], %20 {strides = array<i32>} : memref<1x16x128xf32, #tpu.memory_space<vmem>>, vector<1x16x128xf32>,
      %c0_8 = arith.constant 0 : index
      %c0_9 = arith.constant 0 : index
      %c0_10 = arith.constant 0 : index
      %21 = vector.load %arg8[%c0_8, %c0_9, %c0_10] : memref<1x1x64xf32, #tpu.memory_space<vmem>>, vector<1x1x64xf32>
      %22 = vector.shape_cast %21 : vector<1x1x64xf32> to vector<1x64xf32>
      %cst_11 = arith.constant 0.353553385 : f32
      %23 = vector.broadcast %cst_11 : f32 to vector<1x64xf32>
      %24 = arith.mulf %22, %23 : vector<1x64xf32>
      %c0_12 = arith.constant 0 : index
      %c0_13 = arith.constant 0 : index
      %c0_14 = arith.constant 0 : index
      %25 = vector.load %arg8[%c0_12, %c0_13, %c0_14] : memref<1x1x64xf32, #tpu.memory_space<vmem>>, vector<1x1x64xf32>
      %26 = vector.shape_cast %25 : vector<1x1x64xf32> to vector<1x64xf32>
      %27 = vector.shape_cast %24 : vector<1x64xf32> to vector<1x1x64xf32>
      tpu.vector_store %arg8[%c0_12, %c0_13, %c0_14], %27 {strides = array<i32>} : memref<1x1x64xf32, #tpu.memory_space<vmem>>, vector<1x1x64xf32>,
    } else {
    }
    return
  }
  func.func @transform_0(%arg0: i32, %arg1: i32, %arg2: i32, %arg3: memref<2xi32, #tpu.memory_space<smem>>) -> (i32, i32) {
    %c2_i32 = arith.constant 2 : i32
    %0 = arith.muli %arg1, %c2_i32 : i32
    %1 = arith.addi %0, %arg2 : i32
    %c0_i32 = arith.constant 0 : i32
    return %1, %arg0 : i32, i32
  }
  func.func @transform_1(%arg0: i32, %arg1: i32, %arg2: i32, %arg3: memref<2xi32, #tpu.memory_space<smem>>) -> (i32, i32) {
    %c0_i32 = arith.constant 0 : i32
    %c0_i32_0 = arith.constant 0 : i32
    %c0_i32_1 = arith.constant 0 : i32
    return %c0_i32, %c0_i32_0 : i32, i32
  }
  func.func @transform_2(%arg0: i32, %arg1: i32, %arg2: i32, %arg3: memref<2xi32, #tpu.memory_space<smem>>) -> (i32, i32) {
    %c0_i32 = arith.constant 0 : i32
    %c0_i32_0 = arith.constant 0 : i32
    %c0_i32_1 = arith.constant 0 : i32
    return %c0_i32, %c0_i32_0 : i32, i32
  }
  func.func @transform_3(%arg0: i32, %arg1: i32, %arg2: i32, %arg3: memref<2xi32, #tpu.memory_space<smem>>) -> (i32, i32, i32) {
    %c2_i32 = arith.constant 2 : i32
    %0 = arith.muli %arg0, %c2_i32 : i32
    %1 = arith.addi %0, %arg1 : i32
    %c0_i32 = arith.constant 0 : i32
    %c0_i32_0 = arith.constant 0 : i32
    %c0_i32_1 = arith.constant 0 : i32
    return %1, %c0_i32, %c0_i32_0 : i32, i32, i32
  }
  func.func @transform_4(%arg0: i32, %arg1: i32, %arg2: i32, %arg3: memref<2xi32, #tpu.memory_space<smem>>) -> (i32, i32, i32) {
    %c2_i32 = arith.constant 2 : i32
    %0 = arith.muli %arg0, %c2_i32 : i32
    %1 = arith.addi %0, %arg1 : i32
    %c0_i32 = arith.constant 0 : i32
    %c0_i32_0 = arith.constant 0 : i32
    %c0_i32_1 = arith.constant 0 : i32
    return %1, %c0_i32, %c0_i32_0 : i32, i32, i32
  }
}

</mosaic_0001>

<bundles_post_ra>
// kernel: tpu_custom_call.1
= control target key start
LH: loop header
LB: loop body
LE: loop exit
PB: predicated region body
PF: predicated region fallthrough
CT: control target
= control target key end

     0   :  { %s1731_s21 = smov [#allocation3]   ;;  %s2194_s0 = inlined_call_operand.vmem [shape: s32[2], index: 0, kind: input, shape index: {}]   ;;  %s2195_s1 = inlined_call_operand.vmem [shape: f32[32,256], index: 1, kind: input, shape index: {}]   ;;  %s2196_s2 = inlined_call_operand.vmem [shape: bf16[128,160], index: 2, kind: input, shape index: {}]   ;;  %s2197_s3 = inlined_call_operand.vmem [shape: f32[1,160], index: 3, kind: input, shape index: {}]   ;;  %s2198_s4 = inlined_call_operand.hbm [shape: f32[4,16,128], index: 4, kind: output, shape index: {0}]   ;;  %s2199_s5 = inlined_call_operand.hbm [shape: f32[4,1,64], index: 5, kind: output, shape index: {1}]  }
   0x1   :  { %2206 = sst [smem:[#allocation17_spill]] %s2195_s1  ;;  %s12_s20 = sshll.u32 %s2194_s0, 4  ;;  %s13_s20 = int_to_ptr.vmem [resolvable:$true] %s12_s20 }
   0x2   :  { %15 = dma.vmem_to_smem %s13_s20, 16, %s1731_s21, [#allocation2] }
   0x3   :  { %1681 = dma.done.wait [#allocation2], 16 }
   0x4   :  { %1682 = vsyncadd [#allocation2], 4294967280 }
   0x5   :  { %18 = sfence }
   0x6   :  { %19 = vsyncpa [#allocation5], 0 }
   0x7   :  { %21 = vsyncpa [#allocation5 + $0x1], 0 }
   0x8   :  { %22 = vsyncpa [#allocation7], 0 }
   0x9   :  { %24 = vsyncpa [#allocation7 + $0x1], 0  ;;  %s1782_s22 = smov 0   ;;  %s1784_s23 = smov 0  }
   0xa   :  { %s1786_s24 = smov 0   ;;  %s1788_s25 = smov 0  }
   0xb   :  { %s1790_s26 = smov 0   ;;  %s1792_s0 = smov 0  }
   0xc   :  { %s1794_s27 = smov 0   ;;  %s1796_s28 = smov 0  }
   0xd   :  { %s1798_s29 = smov 0   ;;  %s1800_s30 = smov 0  }
   0xe LB: > { %2207 = sst [smem:[#allocation11_spill]] %s1717_s27  ;;  %s1329_s6 = sadd.s32 4294967295, %s1729_s30   ;;  %s1729_s30 = sphi %s1800_s30, %s30_s30   ;;  %s1725_s29 = sphi %s1798_s29, %s2222_s29   ;;  %s1721_s28 = sphi %s1796_s28, %s2221_s28   ;;  %s1717_s27 = sphi %s1794_s27, %s2220_s27   ;;  %s1713_s0 = sphi %s1792_s0, %s2219_s0   ;;  %s1709_s26 = sphi %s1790_s26, %s2218_s26   ;;  %s1705_s25 = sphi %s1788_s25, %s2217_s25   ;;  %s1701_s24 = sphi %s1786_s24, %s2225_s24   ;;  %s1697_s23 = sphi %s1784_s23, %s2224_s23   ;;  %s1693_s22 = sphi %s1782_s22, %s2223_s22  }
   0xf   : > { %2208 = sst [smem:[#allocation12_spill]] %s1721_s28  ;;  %s42_s7 = sadd.s32 1, %s1717_s27 }
  0x10   : > { %2209 = sst [smem:[#allocation13_spill]] %s1725_s29  ;;  %p43_p0 = scmp.ge.s32.totalorder %s42_s7, 2 }
  0x11   : > { %s45_s8 = sadd.s32 1, %s1721_s28  ;;  %s1330_s9 = sadd.s32 4294967294, %s1729_s30  }
  0x12   : > { %s49_s10 = sadd.s32 1, %s1725_s29  ;;  %s2227_s7 = smov (%p43_p0, %s42_s7), 0 }
  0x13   : > { %2210 = sst [smem:[#allocation14_spill]] %s2227_s7  ;;  %s2229_s8 = smov (!%p43_p0, %s45_s8), %s1721_s28 }
  0x14   : > { %s1333_s11 = sshll.u32 %s1725_s29, 1  ;;  %p144_p1 = scmp.ne.s32.totalorder %s1701_s24, %s1697_s23 }
  0x15   : > { %p47_p2 = scmp.ge.s32.totalorder %s2229_s8, 2  ;;  %p145_p3 = scmp.eq.s32.totalorder %s1329_s6, 7 }
  0x16   : > { %p150_p4 = scmp.ne.s32.totalorder %s1697_s23, %s1693_s22  ;;  %p151_p5 = scmp.eq.s32.totalorder %s1330_s9, 7 }
  0x17   : > { %s2231_s8 = smov (%p47_p2, %s2229_s8), 0  ;;  %s2233_s10 = smov (!%p47_p2, %s49_s10), %s1725_s29 }
  0x18   : > { %2211 = sst [smem:[#allocation15_spill]] %s2231_s8  ;;  %p1848_p6 = por %p145_p3, %p144_p1 }
  0x19   : > { %p1852_p7 = por %p151_p5, %p150_p4  ;;  %p51_p8 = scmp.ge.s32.totalorder %s2233_s10, 2 }
  0x1a   : > { %p1339_p9 = scmp.ge.s32.totalorder %s1729_s30, 1  ;;  %p220_p10 = scmp.lt.s32.totalorder %s1729_s30, 9 }
  0x1b   : > { %s2235_s10 = smov (%p51_p8, %s2233_s10), 0  ;;  %s128_s14 = sadd.s32 %s1721_s28, %s1333_s11 }
  0x1c   : > { %2214 = sst [smem:[#allocation16_spill]] %s2235_s10  ;;  %p221_p11 = pnand %p1339_p9, %p220_p10 }
  0x1d   : > { %s1334_s15 = sshll.u32 %s2235_s10, 1  ;;  %s134_s18 = sadd.s32 1, %s1701_s24 }
  0x1e   : > { %s130_s16 = sadd.s32 %s1334_s15, %s2231_s8  ;;  %224 = sbr.rel (%p221_p11) target bundleno = 1338 (0x53a), region = 32 }
  0x1f   : > { %s131_s17 = ssub.s32 %s128_s14, %s130_s16  ;;  %s1868_s20 = sand.u32 (!%p221_p11), 1, %s1697_s23  }
  0x20   : > { %p132_p12 = scmp.eq.s32.totalorder %s131_s17, 0  ;;  %s1341_s21 = sshll.u32 (!%p221_p11), %s1709_s26, 1 }
  0x21   : > { %s1340_s6 = sshll.u32 (!%p221_p11), %s1868_s20, 4  ;;  %s1873_s9 = sadd.s32 (!%p221_p11), %s1705_s25, %s1341_s21 }
  0x22   : > { %s1865_s19 = scalar_select %p132_p12, %s1701_s24, %s134_s18  }
  0x23   : > { %p257_p13 = scmp.lt.s32.totalorder %s1873_s9, 3  ;;  %p259_p0 = scmp.lt.s32.totalorder %s1713_s0, 1 }
  0x24   : > { %s2215_s1 = sld [smem:[#allocation17_spill]]  ;;  %s1884_s7 = scalar_lea.vmem [#allocation4], %s1340_s6 }
  0x25   : > { %s258_s11 = scalar_select %p257_p13, %s1873_s9, 3 }
  0x26   : > { %s260_s14 = scalar_select %p259_p0, %s1713_s0, 1 }
  0x27   : > { %s1342_s15 = sshll.u32 %s258_s11, 1  ;;  %s1887_s29 = scalar_lea.vmem [#allocation6], %s1868_s20 }
  0x28   : > { %s262_s16 = sadd.s32 %s1342_s15, %s260_s14  ;;  %p1344_p1 = scmp.ne.s32.totalorder %s1705_s25, 0 }
  0x29   : > { %s1343_s17 = sshll.u32 %s262_s16, 3 }
  0x2a   : > { %s1882_s8 = scalar_lea.vmem %s2215_s1, %s1343_s17  ;;  %275 = sbr.rel (%p1344_p1) target bundleno = 51 (0x33), region = 36 }
  0x2f   : > { %vm278_vm0 = vcmask 516096   ;;  %v1732_v0 = vmov 0.0  }
  0x30   : > { %276 = vst [vmem:[%s1884_s7] sm:$0xff] %v1732_v0 }
  0x31   : > { %277 = vst [vmem:[%s1884_s7 + $0x8] sm:$0xff] %v1732_v0 }
  0x32   : > { %279 = vst.msk [vmem:[%s1887_s29] sm:$0x1] %vm278_vm0, %v1732_v0 }
  0x33 PF: > { %s1894_s10 = sld [smem:[#allocation3 + %s1713_s0]]  ;;  %s2204_s21 = sshll.u32 %s1873_s9, 3 }
  0x39   : > { %p1347_p2 = scmp.ge.s32.totalorder %s2204_s21, %s1894_s10 }
  0x3a   : > { %s2216_s17 = sshll.u32 (!%p1347_p2), %s1873_s9, 3  ;;  %s1735_s9 = smov (!%p1347_p2), 96  }
  0x3b   : > { %287 = sbr.rel (%p1347_p2) target bundleno = 1293 (0x50d), region = 40  ;;  %s1744_s11 = smov (!%p1347_p2), 112  }
  0x3c   : > { %s1745_s14 = smov (!%p1347_p2), 104   ;;  %s1746_s15 = smov (!%p1347_p2), 32  }
  0x40   : > { %v1406_v1 = vld [vmem:[%s2196_s2 + $0x70] sm:$0xf]  ;;  %v1452_v2 = vld [vmem:[%s2196_s2 + $0x74] sm:$0xf0]  ;;  %v1451_v3 = vld [vmem:[%s2196_s2 + $0x74] sm:$0xf]  ;;  %v418_v51 = vlaneseq  ;;  %v420_v53 = vstv %s2216_s17 }
  0x41   : > { %v1407_v4 = vor.u32 %v1452_v2, %v1406_v1  ;;  %v1408_v5 = vld [vmem:[%s2196_s2 + $0x78] sm:$0xf0]  ;;  %v1398_v6 = vld [vmem:[%s2196_s2 + $0x60] sm:$0xf]  ;;  %v1450_v7 = vld [vmem:[%s2196_s2 + $0x64] sm:$0xf0]  ;;  %v422_v56 = vstv %s1894_s10 }
  0x42   : > { %v1411_v8 = vor.u32 %v1451_v3, %v1408_v5  ;;  %v1449_v9 = vld [vmem:[%s2196_s2 + $0x64] sm:$0xf]  ;;  %v1400_v10 = vld [vmem:[%s2196_s2 + $0x68] sm:$0xf0]  ;;  %v1399_v11 = vor.u32 %v1450_v7, %v1398_v6  ;;  %v1390_v13 = vld [vmem:[%s2196_s2 + $0x50] sm:$0xf] }
  0x43   : > { %392 = vmatpush.bf16.msra.mxu0 %v1407_v4  ;;  %v1403_v12 = vor.u32 %v1449_v9, %v1400_v10  ;;  %v1448_v14 = vld [vmem:[%s2196_s2 + $0x54] sm:$0xf0]  ;;  %v1447_v15 = vld [vmem:[%s2196_s2 + $0x54] sm:$0xf]  ;;  %v1392_v16 = vld [vmem:[%s2196_s2 + $0x58] sm:$0xf0] }
  0x44   : > { %405 = vmatpush.bf16.msra.mxu1 %v1411_v8  ;;  %v1391_v17 = vor.u32 %v1448_v14, %v1390_v13  ;;  %v1395_v18 = vor.u32 %v1447_v15, %v1392_v16  ;;  %v1382_v19 = vld [vmem:[%s2196_s2 + $0x40] sm:$0xf]  ;;  %v1446_v20 = vld [vmem:[%s2196_s2 + $0x44] sm:$0xf0]  ;;  %v1445_v21 = vld [vmem:[%s2196_s2 + $0x44] sm:$0xf] }
  0x45   : > { %v1384_v22 = vld [vmem:[%s2196_s2 + $0x48] sm:$0xf0]  ;;  %v1383_v23 = vor.u32 %v1446_v20, %v1382_v19  ;;  %v1374_v25 = vld [vmem:[%s2196_s2 + $0x30] sm:$0xf]  ;;  %v1444_v26 = vld [vmem:[%s2196_s2 + $0x34] sm:$0xf0] }
  0x46   : > { %v1387_v24 = vor.u32 %v1445_v21, %v1384_v22  ;;  %v1443_v27 = vld [vmem:[%s2196_s2 + $0x34] sm:$0xf]  ;;  %v1376_v28 = vld [vmem:[%s2196_s2 + $0x38] sm:$0xf0]  ;;  %v1375_v29 = vor.u32 %v1444_v26, %v1374_v25  ;;  %v1366_v31 = vld [vmem:[%s2196_s2 + $0x20] sm:$0xf] }
  0x47   : > { %393 = vmatpush.bf16.msra.mxu0 %v1399_v11  ;;  %v1379_v30 = vor.u32 %v1443_v27, %v1376_v28  ;;  %v1442_v32 = vld [vmem:[%s2196_s2 + $0x24] sm:$0xf0]  ;;  %v1441_v33 = vld [vmem:[%s2196_s2 + $0x24] sm:$0xf]  ;;  %v1368_v34 = vld [vmem:[%s2196_s2 + $0x28] sm:$0xf0] }
  0x48   : > { %406 = vmatpush.bf16.msra.mxu1 %v1403_v12  ;;  %v1367_v35 = vor.u32 %v1442_v32, %v1366_v31  ;;  %v1371_v36 = vor.u32 %v1441_v33, %v1368_v34  ;;  %v1358_v37 = vld [vmem:[%s2196_s2 + $0x10] sm:$0xf]  ;;  %v1440_v38 = vld [vmem:[%s2196_s2 + $0x14] sm:$0xf0]  ;;  %v1439_v39 = vld [vmem:[%s2196_s2 + $0x14] sm:$0xf] }
  0x49   : > { %v1360_v40 = vld [vmem:[%s2196_s2 + $0x18] sm:$0xf0]  ;;  %v1359_v41 = vor.u32 %v1440_v38, %v1358_v37  ;;  %v1350_v43 = vld [vmem:[%s2196_s2] sm:$0xf]  ;;  %v1438_v44 = vld [vmem:[%s2196_s2 + $0x4] sm:$0xf0] }
  0x4a   : > { %v1363_v42 = vor.u32 %v1439_v39, %v1360_v40  ;;  %v1437_v45 = vld [vmem:[%s2196_s2 + $0x4] sm:$0xf]  ;;  %v1352_v46 = vld [vmem:[%s2196_s2 + $0x8] sm:$0xf0]  ;;  %v1351_v47 = vor.u32 %v1438_v44, %v1350_v43  ;;  %v419_v52 = vshrl.u32 %v418_v51, 7  ;;  %v1733_v60 = vmov 0.0  }
  0x4b   : > { %394 = vmatpush.bf16.msra.mxu0 %v1391_v17  ;;  %v288_v48 = vld [vmem:[%s1882_s8] sm:$0xff]  ;;  %v1355_v49 = vor.u32 %v1437_v45, %v1352_v46  ;;  %s1734_s8 = smov 64   ;;  %v1736_v19 = vmov 2102212464   ;;  %v1737_v21 = vmov 920167782  }
  0x4c   : > { %407 = vmatpush.bf16.msra.mxu1 %v1395_v18  ;;  %v289_v50 = vpack.c.bf16 %v288_v48, %v288_v48  ;;  %v421_v54 = vadd.s32 %v420_v53, %v419_v52  ;;  %v306_v55 = vld [vmem:[%s2197_s3] sm:$0x3]  ;;  %v1739_v26 = vmov 683565275   ;;  %v1740_v28 = vmov 2475754826  }
  0x4d   : > { %v308_v57 = vperm.slane %v306_v55, 0  ;;  %v309_v58 = vperm.slane %v306_v55, 1  ;;  %v1741_v31 = vmov 2131351028   ;;  %s1743_s10 = smov 120  }
  0x4e   : > { %vm423_vm1 = vcmp.lt.s32.totalorder %v421_v54, %v422_v56 }
  0x4f   : > { %395 = vmatpush.bf16.msra.mxu0 %v1383_v23  ;;  %v2003_v61 = vsel %vm423_vm1, 1.0, %v1733_v60 }
  0x50   : > { %408 = vmatpush.bf16.msra.mxu1 %v1387_v24  ;;  %v1738_v24 = vmov 1326507024  }
  0x53   : > { %396 = vmatpush.bf16.msra.mxu0 %v1375_v29 }
  0x54   : > { %409 = vmatpush.bf16.msra.mxu1 %v1379_v30 }
  0x57   : > { %397 = vmatpush.bf16.msra.mxu0 %v1367_v35 }
  0x58   : > { %410 = vmatpush.bf16.msra.mxu1 %v1371_v36 }
  0x5b   : > { %398 = vmatpush.bf16.msra.mxu0 %v1359_v41 }
  0x5c   : > { %411 = vmatpush.bf16.msra.mxu1 %v1363_v42 }
  0x5f   : > { %399 = vmatpush.bf16.msra.mxu0 %v1351_v47 }
  0x60   : > { %412 = vmatpush.bf16.msra.mxu1 %v1355_v49 }
  0x62   : > { %400 = vmatmul.bf16.vlgmr.msra.gmra.mxu0 %v289_v50 }
  0x63   : > { %413 = vmatmul.bf16.vlgmr.msra.gmra.mxu1 %v289_v50 }
  0xdf   : > { %v401_v59 = vpop.f32.mrf.mxu0 }
  0xe0   : > { %v2005_v62 = vadd.f32 %v401_v59, %v308_v57  ;;  %v414_v63 = vpop.f32.mrf.mxu1 }
  0xe1   : > { %v415_v0 = vadd.f32 %v414_v63, %v309_v58 }
  0xe2   : > { %v433_v1 = vand.u32 2139095040, %v2005_v62  ;;  %v427_v2 = vmul.f32 %v2003_v61, %v2005_v62  ;;  %v430_v7 = vand.u32 2147483647, %v2005_v62  ;;  %vm432_vm14 = vcmp.lt.s32.totalorder %v2005_v62, 0 }
  0xe3   : > { %v428_v3 = vmul.f32 %v2003_v61, %v415_v0 }
  0xe4   : > { %v434_v4 = vshrl.u32 %v433_v1, 23  ;;  %v437_v13 = vand.u32 8388607, %v430_v7  ;;  %vm431_vm15 = vcmp.le.f32.partialorder %v430_v7, 0.7853982 }
  0xe5   : > { %v2011_v5 = vpack.c.bf16 %v428_v3, %v427_v2 }
  0xe6   : > { %v1413_v6 = vadd.s32 4294967169, %v434_v4  ;;  %v438_v17 = vor.u32 8388608, %v437_v13 }
  0xe7   : > { %v403_v8 = vpop.f32.mrf.mxu0  ;;  %v823_v9 = vunpack.c.l.b16 %v2011_v5 }
  0xe8   : > { %v440_v10 = vadd.s32 1, %v1413_v6  ;;  %v416_v11 = vpop.f32.mrf.mxu1  ;;  %v2032_v38 = vshll.u32 %v438_v17, 8 }
  0xe9   : > { %v2015_v12 = vpack.c.b16 %v823_v9, %v823_v9  ;;  %v1742_v9 = vmov 0  }
  0xea   : > { %vm441_vm2 = vcmp.gt.s32.totalorder %v440_v10, 0  ;;  %v479_v48 = vand.u32 65535, %v2032_v38  ;;  %v480_v50 = vshrl.u32 %v2032_v38, 16 }
  0xeb   : > { %v442_v14 = vsel %vm441_vm2, %v440_v10, 0  ;;  %907 = vrot.lane.b32.xlu2 %v2015_v12, %s1734_s8  ;;  %825 = vrot.lane.b32.xlu1 %v2015_v12, %s1735_s9 }
  0xec   : > { %v444_v15 = vand.u32 31, %v442_v14  ;;  %v2025_v18 = vshrl.u32 %v442_v14, 5 }
  0xee   : > { %v2023_v16 = vsub.s32 32, %v444_v15  ;;  %v456_v20 = vshll.u32 %v1736_v19, %v444_v15  ;;  %v459_v22 = vshll.u32 %v1737_v21, %v444_v15  ;;  %v447_v27 = vshll.u32 %v1739_v26, %v444_v15 }
  0xef   : > { %v450_v30 = vshll.u32 %v1740_v28, %v444_v15  ;;  %v453_v33 = vshll.u32 %v1741_v31, %v444_v15  ;;  %vm465_vm3 = vcmp.lt.s32.totalorder %v2025_v18, 4  ;;  %vm462_vm4 = vcmp.lt.s32.totalorder %v2025_v18, 1 }
  0xf0   : > { %v457_v23 = vshrl.u32 %v1737_v21, %v2023_v16  ;;  %v460_v25 = vshrl.u32 %v1738_v24, %v2023_v16  ;;  %v448_v29 = vshrl.u32 %v1740_v28, %v2023_v16  ;;  %v451_v32 = vshrl.u32 %v1741_v31, %v2023_v16 }
  0xf1   : > { %v454_v34 = vshrl.u32 %v1736_v19, %v2023_v16  ;;  %vm464_vm5 = vcmp.lt.s32.totalorder %v2025_v18, 3  ;;  %vm463_vm6 = vcmp.lt.s32.totalorder %v2025_v18, 2  ;;  %v446_v15 = vshrl.u32 %v1739_v26, %v2023_v16 }
  0xf2   : > { %v458_v35 = vor.u32 %v457_v23, %v456_v20  ;;  %v461_v36 = vor.u32 %v460_v25, %v459_v22  ;;  %v449_v37 = vor.u32 %v448_v29, %v447_v27  ;;  %v452_v39 = vor.u32 %v451_v32, %v450_v30 }
  0xf3   : > { %v455_v40 = vor.u32 %v454_v34, %v453_v33 }
  0xf4   : > { %v471_v41 = vsel %vm465_vm3, %v458_v35, 920167782  ;;  %v475_v42 = vsel %vm465_vm3, %v461_v36, 1326507024  ;;  %v470_v43 = vsel %vm462_vm4, %v449_v37, %v452_v39  ;;  %v466_v23 = vsel %vm462_vm4, %v446_v15, %v449_v37 }
  0xf5   : > { %v472_v44 = vsel %vm464_vm5, %v455_v40, %v471_v41  ;;  %v474_v45 = vsel %vm462_vm4, %v452_v39, %v455_v40  ;;  %v476_v47 = vsel %vm464_vm5, %v458_v35, %v475_v42  ;;  %v467_v11 = vsel %vm465_vm3, %v455_v40, 2102212464 }
  0xf6   : > { %v473_v46 = vsel %vm463_vm6, %v470_v43, %v472_v44  ;;  %v477_v49 = vsel %vm463_vm6, %v474_v45, %v476_v47  ;;  %v468_v24 = vsel %vm464_vm5, %v452_v39, %v467_v11 }
  0xf7   : > { %v503_v51 = vand.u32 65535, %v473_v46  ;;  %v504_v52 = vshrl.u32 %v473_v46, 16  ;;  %v481_v53 = vand.u32 65535, %v477_v49  ;;  %v482_v54 = vshrl.u32 %v477_v49, 16 }
  0xf8   : > { %v469_v16 = vsel %vm463_vm6, %v466_v23, %v468_v24  ;;  %vm573_vm6 = vweird.f32 %v2005_v62 }
  0xf9   : > { %v506_v55 = vmul.u32 %v504_v52, %v479_v48  ;;  %v507_v56 = vmul.u32 %v503_v51, %v480_v50  ;;  %v484_v57 = vmul.u32 %v482_v54, %v479_v48  ;;  %v485_v58 = vmul.u32 %v481_v53, %v480_v50 }
  0xfa   : > { %v505_v59 = vmul.u32 %v503_v51, %v479_v48  ;;  %v483_v63 = vmul.u32 %v481_v53, %v479_v48  ;;  %v508_v1 = vmul.u32 %v504_v52, %v480_v50  ;;  %v486_v2 = vmul.u32 %v482_v54, %v480_v50 }
  0xfb   : > { %v509_v60 = vshll.u32 %v506_v55, 16  ;;  %v487_v0 = vshll.u32 %v484_v57, 16  ;;  %v511_v3 = vshll.u32 %v507_v56, 16  ;;  %v489_v6 = vshll.u32 %v485_v58, 16 }
  0xfc   : > { %v510_v21 = vshrl.u32 %v506_v55, 16  ;;  %v488_v25 = vshrl.u32 %v484_v57, 16  ;;  %v512_v28 = vshrl.u32 %v507_v56, 16  ;;  %v490_v30 = vshrl.u32 %v485_v58, 16 }
  0xfd   : > { %vm513_vm7 = vc.u32 %v505_v59, %v509_v60  ;;  %v515_v4 = vadd.s32 %v509_v60, %v505_v59  ;;  %vm491_vm8 = vc.u32 %v483_v63, %v487_v0  ;;  %v493_v8 = vadd.s32 %v487_v0, %v483_v63 }
  0xfe   : > { %v514_v10 = vsel %vm513_vm7, 1, %v1742_v9  ;;  %v492_v13 = vsel %vm491_vm8, 1, %v1742_v9  ;;  %v523_v35 = vmul.u32 %v2032_v38, %v469_v16  ;;  %vm761_vm7 = vcmask 1043456  }
  0xff   : > { %v516_v14 = vadd.s32 %v514_v10, %v508_v1  ;;  %vm517_vm9 = vc.u32 %v515_v4, %v511_v3  ;;  %v494_v17 = vadd.s32 %v492_v13, %v486_v2  ;;  %vm495_vm10 = vc.u32 %v493_v8, %v489_v6 }
 0x100   : > { %v518_v19 = vsel %vm517_vm9, 1, %v1742_v9  ;;  %v496_v20 = vsel %vm495_vm10, 1, %v1742_v9  ;;  %v519_v33 = vadd.s32 %v515_v4, %v511_v3  ;;  %vm757_vm8 = vcmask 64512  }
 0x101   : > { %v520_v22 = vadd.s32 %v518_v19, %v516_v14  ;;  %v498_v27 = vadd.s32 %v496_v20, %v494_v17  ;;  %vm796_vm9 = vcmask 253952   ;;  %vm880_vm10 = vcmask 261120  }
 0x103   : > { %v521_v29 = vadd.s32 %v520_v22, %v510_v21  ;;  %v499_v31 = vadd.s32 %v498_v27, %v488_v25 }
 0x105   : > { %v522_v26 = vadd.s32 %v521_v29, %v512_v28  ;;  %v500_v32 = vadd.s32 %v499_v31, %v490_v30  ;;  %v426_v30 = vpack.c.bf16 %v2003_v61, %v2003_v61 }
 0x107   : > { %v526_v34 = vadd.s32 1, %v522_v26  ;;  %vm525_vm11 = vc.u32 %v500_v32, %v519_v33  ;;  %v524_v47 = vadd.s32 %v519_v33, %v500_v32 }
 0x109   : > { %v527_v36 = vsel %vm525_vm11, %v526_v34, %v522_v26  ;;  %vm804_vm11 = vcmask 516352  }
 0x10a   : > { %v528_v37 = vadd.s32 %v527_v36, %v523_v35 }
 0x10c   : > { %v529_v40 = vadd.s32 536870912, %v528_v37 }
 0x10e   : > { %v530_v39 = vshrl.u32 %v529_v40, 30 }
 0x110   : > { %v531_v41 = vshll.u32 %v530_v39, 30  ;;  %v554_v60 = vsub.s32 4, %v530_v39 }
 0x112   : > { %v532_v42 = vsub.s32 %v528_v37, %v531_v41  ;;  %v555_v3 = vsel %vm432_vm14, %v554_v60, %v530_v39  ;;  %v878_v60 = vld [vmem:[%s1884_s7] sm:$0xff] }
 0x113   : > { %v557_v8 = vsel %vm431_vm15, 0, %v555_v3 }
 0x114   : > { %vm533_vm12 = vcmp.lt.s32.totalorder %v532_v42, 0  ;;  %v534_v43 = vsub.s32 0, %v532_v42  ;;  %v574_v14 = vadd.s32 3, %v557_v8  ;;  %v730_v20 = vand.u32 3, %v557_v8 }
 0x116   : > { %v535_v44 = vsel %vm533_vm12, %v534_v43, %v532_v42  ;;  %v575_v21 = vand.u32 3, %v574_v14  ;;  %vm731_vm0 = vcmp.lt.s32.totalorder %v730_v20, 2  ;;  %vm732_vm1 = vcmp.eq.s32.totalorder %v730_v20, 0 }
 0x117   : > { %v536_v45 = vclz %v535_v44  ;;  %vm735_vm5 = vcmp.eq.s32.totalorder %v730_v20, 2  ;;  %vm972_vm12 = vcmask 523520  }
 0x118   : > { %vm576_vm2 = vcmp.lt.s32.totalorder %v575_v21, 2  ;;  %vm577_vm3 = vcmp.eq.s32.totalorder %v575_v21, 0  ;;  %vm580_vm4 = vcmp.eq.s32.totalorder %v575_v21, 2 }
 0x119   : > { %v1414_v46 = vadd.s32 4294967294, %v536_v45 }
 0x11b   : > { %vm1415_vm13 = vcmp.lt.s32.totalorder %v1414_v46, 0 }
 0x11c   : > { %v539_v18 = vsel %vm1415_vm13, 0, %v1414_v46  ;;  %v1090_v46 = vunpack.c.h.b16 %v2011_v5  ;;  %vm1062_vm13 = vcmask 785920  }
 0x11d   : > { %v540_v48 = vsub.s32 32, %v539_v18  ;;  %v544_v49 = vsub.s32 4294967266, %v539_v18  ;;  %v541_v50 = vshll.u32 %v532_v42, %v539_v18 }
 0x11e   : > { %v1091_v18 = vpack.c.b16 %v1090_v46, %v1090_v46 }
 0x11f   : > { %v542_v51 = vshrl.u32 %v524_v47, %v540_v48  ;;  %v545_v38 = vadd.s32 127, %v544_v49 }
 0x121   : > { %v543_v52 = vor.u32 %v542_v51, %v541_v50  ;;  %v546_v53 = vshll.u32 %v545_v38, 23 }
 0x123   : > { %v547_v54 = vor.u32 4788187, %v546_v53  ;;  %v550_v56 = vcvt.s32.f32 %v543_v52  ;;  %v794_v53 = vld [vmem:[%s1887_s29] sm:$0x1] }
 0x125   : > { %v548_v55 = vand.u32 2147483647, %v547_v54 }
 0x127   : > { %v551_v57 = vmul.f32 %v550_v56, %v548_v55 }
 0x129   : > { %v552_v58 = vxor.u32 2147483648, %v551_v57 }
 0x12b   : > { %v553_v59 = vsel %vm432_vm14, %v552_v58, %v551_v57  ;;  %vm1152_vm14 = vcmask 1048320  }
 0x12c   : > { %v556_v63 = vsel %vm431_vm15, %v2005_v62, %v553_v59  ;;  %v882_v59 = vld [vmem:[%s1884_s7 + $0x8] sm:$0xff] }
 0x12d   : > { %v558_v0 = vmul.f32 %v556_v63, %v556_v63 }
 0x12f   : > { %v559_v1 = vmul.f32 -0.001358992, %v558_v0  ;;  %v566_v2 = vmul.f32 -0.00019511016, %v558_v0 }
 0x131   : > { %v560_v4 = vadd.f32 0.041655596, %v559_v1  ;;  %v567_v6 = vadd.f32 0.008332121, %v566_v2 }
 0x133   : > { %v561_v9 = vmul.f32 %v560_v4, %v558_v0  ;;  %v568_v10 = vmul.f32 %v567_v6, %v558_v0 }
 0x135   : > { %v562_v11 = vadd.f32 -0.4999988, %v561_v9  ;;  %v569_v13 = vadd.f32 -0.16666654, %v568_v10 }
 0x137   : > { %v563_v15 = vmul.f32 %v562_v11, %v558_v0  ;;  %v570_v17 = vmul.f32 %v569_v13, %v558_v0 }
 0x139   : > { %v564_v19 = vadd.f32 1.0, %v563_v15  ;;  %v571_v7 = vadd.f32 1.0, %v570_v17 }
 0x13b   : > { %v572_v22 = vmul.f32 %v571_v7, %v556_v63  ;;  %v581_v23 = vxor.u32 2147483648, %v564_v19 }
 0x13d   : > { %v578_v24 = vxor.u32 2147483648, %v572_v22  ;;  %v582_v27 = vsel %vm580_vm4, %v581_v23, %v572_v22  ;;  %v737_v29 = vsel %vm735_vm5, %v581_v23, %v572_v22 }
 0x13f   : > { %v579_v25 = vsel %vm577_vm3, %v564_v19, %v578_v24  ;;  %v734_v28 = vsel %vm732_vm1, %v564_v19, %v578_v24 }
 0x140   : > { %v583_v31 = vsel %vm576_vm2, %v579_v25, %v582_v27  ;;  %v738_v16 = vsel %vm731_vm0, %v734_v28, %v737_v29 }
 0x141   : > { %v584_v26 = vsel %vm573_vm6, nan, %v583_v31  ;;  %v739_v32 = vsel %vm573_vm6, nan, %v738_v16 }
 0x142   : > { %v585_v33 = vpack.c.bf16 %v584_v26, %v584_v26  ;;  %v740_v34 = vpack.c.bf16 %v739_v32, %v739_v32 }
 0x144   : > { %1564 = vxpose.binary.xlu0.c.b16.start.end [1/2] (short) (narrow) %v585_v33, %v426_v30, 16  ;;  %v763_v35 = vsel %vm761_vm7, %v585_v33, 0  ;;  %v779_v36 = vsel %vm761_vm7, %v740_v34, 0  ;;  %v886_v37 = vunpack.c.l.b16 %v585_v33  ;;  %v929_v39 = vunpack.c.l.b16 %v740_v34 }
 0x145   : > { %846 = vxpose.xlu1.c.b16.start.end [1/1] (short) (narrow) %v740_v34, 16  ;;  %772 = vmatpush.bf16.msra.mxu2 %v763_v35  ;;  %v908_v41 = vpop.permute.xlu2 %907 }
 0x146   : > { %788 = vmatpush.bf16.msra.mxu3 %v779_v36  ;;  %v887_v40 = vpack.c.b16 %v886_v37, %v886_v37  ;;  %v930_v42 = vpack.c.b16 %v929_v39, %v929_v39  ;;  %v913_v45 = vsel %vm761_vm7, %v908_v41, 0 }
 0x148   : > { %888 = vrot.lane.b32.xlu2 %v887_v40, %s1743_s10 }
 0x150   : > { %981 = vrot.lane.b32.xlu2 %v887_v40, %s1744_s11 }
 0x15d   : > { %v826_v61 = vpop.permute.xlu1 %825 }
 0x15e   : > { %v831_v62 = vsel %vm761_vm7, %v826_v61, 0 }
 0x15f   : > { %840 = vmatpush.bf16.msrb.mxu2 %v831_v62  ;;  %872 = vmatpush.bf16.msrb.mxu3 %v831_v62 }
 0x19f   : > { %931 = vrot.lane.b32.xlu1 %v930_v42, %s1743_s10 }
 0x1a2   : > { %v889_v43 = vpop.permute.xlu2 %888 }
 0x1a3   : > { %891 = vxpose.xlu2.c.b16.start.end [1/1] (short) (narrow) %v889_v43, 16 }
 0x1a7   : > { %1071 = vrot.lane.b32.xlu1 %v887_v40, %s1745_s14 }
 0x1aa   : > { %v982_v38 = vpop.permute.xlu2 %981 }
 0x1af   : > { %1000 = vrot.lane.b32.xlu1 %v2015_v12, %s1746_s15  ;;  %v1096_v12 = vsel %vm761_vm7, %v1091_v18, 0 }
 0x1f0   : > { %v1565_v44 = vpop.trf.xlu0 }
 0x1f1   : > { %1419 = vmatmul.msk.bf16.vlgmr.msra.gmra.mxu2 %vm757_vm8, %v1565_v44  ;;  %1420 = vmatmul.msk.bf16.vlgmr.msra.gmra.mxu3 %vm757_vm8, %v1565_v44  ;;  %v854_v48 = vpop.trf.xlu1 }
 0x1f2   : > { %922 = vmatpush.bf16.msra.mxu2 %v913_v45  ;;  %960 = vmatpush.bf16.msra.mxu3 %v913_v45 }
 0x1f8   : > { %v1566_v47 = vpop.trf.xlu0 }
 0x201   : > { %1421 = vmatmul.msk.bf16.vlgmr.msrb.gmra.mxu2 %vm757_vm8, %v1566_v47  ;;  %1422 = vmatmul.msk.bf16.vlgmr.msrb.gmra.mxu3 %vm757_vm8, %v854_v48 }
 0x202   : > { %1105 = vmatpush.bf16.msrb.mxu2 %v1096_v12  ;;  %1140 = vmatpush.bf16.msrb.mxu3 %v1096_v12 }
 0x20c   : > { %1111 = vrot.lane.b32.xlu2 %v930_v42, %s1745_s14 }
 0x211   : > { %v932_v49 = vpop.permute.xlu1 %931 }
 0x212   : > { %934 = vxpose.xlu0.c.b16.start.end [1/1] (short) (narrow) %v932_v49, 16 }
 0x219   : > { %v1072_v50 = vpop.permute.xlu1 %1071 }
 0x221   : > { %v1001_v51 = vpop.permute.xlu1 %1000 }
 0x222   : > { %v1006_v5 = vsel %vm761_vm7, %v1001_v51, 0 }
 0x223   : > { %1015 = vmatpush.bf16.msrb.mxu0 %v1006_v5  ;;  %1050 = vmatpush.bf16.msrb.mxu1 %v1006_v5 }
 0x244   : > { %v899_v52 = vpop.trf.xlu2 }
 0x245   : > { %1423 = vmatmul.msk.bf16.vlgmr.msra.gmra.mxu2 %vm757_vm8, %v899_v52 }
 0x266   : > { %v1112_v21 = vpop.permute.xlu2 %1111 }
 0x274   : > { %v790_v54 = vpop.f32.mrf.mxu3  ;;  %v774_v55 = vpop.f32.mrf.mxu2 }
 0x275   : > { %v795_v56 = vadd.f32 %v794_v53, %v774_v55 }
 0x277   : > { %797 = vst.msk [vmem:[%s1887_s29] sm:$0x1] %vm796_vm9, %v795_v56 }
 0x27c   : > { %v792_v57 = vpop.f32.mrf.mxu3  ;;  %v776_v58 = vpop.f32.mrf.mxu2 }
 0x27e   : > { %v798_v11 = vld [vmem:[%s1887_s29] sm:$0x1] }
 0x280   : > { %1021 = vrot.lane.b32.xlu0 %v930_v42, %s1744_s11 }
 0x284   : > { %v874_v63 = vpop.f32.mrf.mxu3  ;;  %v842_v0 = vpop.f32.mrf.mxu2 }
 0x285   : > { %v883_v1 = vadd.f32 %v882_v59, %v874_v63  ;;  %v879_v2 = vadd.f32 %v878_v60, %v842_v0 }
 0x287   : > { %884 = vst.msk [vmem:[%s1884_s7 + $0x8] sm:$0xff] %vm880_vm10, %v883_v1 }
 0x288   : > { %800 = vrot.lane.b32.xlu0 %v790_v54, %s1746_s15  ;;  %881 = vst.msk [vmem:[%s1884_s7] sm:$0xff] %vm880_vm10, %v879_v2 }
 0x28c   : > { %v876_v3 = vpop.f32.mrf.mxu3  ;;  %v844_v4 = vpop.f32.mrf.mxu2 }
 0x28e   : > { %v974_v22 = vld [vmem:[%s1884_s7 + $0x8] sm:$0xff] }
 0x28f   : > { %v966_v15 = vld [vmem:[%s1884_s7] sm:$0xff] }
 0x2be   : > { %v942_v6 = vpop.trf.xlu0 }
 0x2bf   : > { %1424 = vmatmul.msk.bf16.vlgmr.msra.gmra.mxu3 %vm757_vm8, %v942_v6 }
 0x2c8   : > { %v924_v8 = vpop.f32.mrf.mxu2 }
 0x2c9   : > { %968 = vrot.lane.b32.xlu1 %v924_v8, %s1746_s15 }
 0x2d0   : > { %v926_v9 = vpop.f32.mrf.mxu2 }
 0x2f2   : > { %v1022_v10 = vpop.permute.xlu0 %1021 }
 0x2fa   : > { %v801_v13 = vpop.permute.xlu0 %800 }
 0x2fb   : > { %v803_v14 = vadd.f32 %v801_v13, %v798_v11 }
 0x2fd   : > { %805 = vst.msk [vmem:[%s1887_s29] sm:$0x1] %vm804_vm11, %v803_v14 }
 0x2fe   : > { %1567 = vxpose.binary.xlu1.c.b16.start.end [1/2] (short) (narrow) %v1022_v10, %v982_v38, 16 }
 0x33b   : > { %v969_v17 = vpop.permute.xlu1 %968 }
 0x33c   : > { %v971_v19 = vadd.f32 %v969_v17, %v966_v15 }
 0x33e   : > { %973 = vst.msk [vmem:[%s1884_s7] sm:$0xff] %vm972_vm12, %v971_v19 }
 0x342   : > { %v962_v7 = vpop.f32.mrf.mxu3 }
 0x343   : > { %976 = vrot.lane.b32.xlu2 %v962_v7, %s1746_s15 }
 0x345   : > { %v1056_v32 = vld [vmem:[%s1884_s7] sm:$0xff] }
 0x34a   : > { %v964_v20 = vpop.f32.mrf.mxu3 }
 0x369   : > { %1570 = vxpose.binary.xlu2.c.b16.start.end [1/2] (short) (narrow) %v1112_v21, %v1072_v50, 16 }
 0x39d   : > { %v977_v23 = vpop.permute.xlu2 %976 }
 0x39e   : > { %v979_v24 = vadd.f32 %v977_v23, %v974_v22 }
 0x3a0   : > { %980 = vst.msk [vmem:[%s1884_s7 + $0x8] sm:$0xff] %vm972_vm12, %v979_v24 }
 0x3a7   : > { %v1064_v61 = vld [vmem:[%s1884_s7 + $0x8] sm:$0xff] }
 0x3aa   : > { %v1568_v25 = vpop.trf.xlu1 }
 0x3ab   : > { %1425 = vmatmul.msk.bf16.vlgmr.msrb.gmra.mxu0 %vm757_vm8, %v1568_v25 }
 0x3b2   : > { %v1569_v27 = vpop.trf.xlu1 }
 0x3b3   : > { %1426 = vmatmul.msk.bf16.vlgmr.msrb.gmra.mxu1 %vm757_vm8, %v1569_v27 }
 0x40a   : > { %v1571_v28 = vpop.trf.xlu2 }
 0x40b   : > { %1427 = vmatmul.msk.bf16.vlgmr.msrb.gmra.mxu2 %vm757_vm8, %v1571_v28 }
 0x412   : > { %v1572_v29 = vpop.trf.xlu2 }
 0x413   : > { %1428 = vmatmul.msk.bf16.vlgmr.msrb.gmra.mxu3 %vm757_vm8, %v1572_v29 }
 0x428   : > { %v1017_v30 = vpop.f32.mrf.mxu0 }
 0x429   : > { %1058 = vrot.lane.b32.xlu2 %v1017_v30, %s1734_s8 }
 0x430   : > { %v1052_v31 = vpop.f32.mrf.mxu1  ;;  %v1019_v16 = vpop.f32.mrf.mxu0 }
 0x431   : > { %1066 = vrot.lane.b32.xlu1 %v1052_v31, %s1734_s8 }
 0x438   : > { %v1054_v26 = vpop.f32.mrf.mxu1 }
 0x483   : > { %v1059_v33 = vpop.permute.xlu2 %1058 }
 0x484   : > { %v1061_v34 = vadd.f32 %v1059_v33, %v1056_v32 }
 0x486   : > { %1063 = vst.msk [vmem:[%s1884_s7] sm:$0xff] %vm1062_vm13, %v1061_v34 }
 0x48d   : > { %v1146_v41 = vld [vmem:[%s1884_s7] sm:$0xff] }
 0x48e   : > { %v1107_v35 = vpop.f32.mrf.mxu2 }
 0x48f   : > { %1148 = vrot.lane.b32.xlu0 %v1107_v35, %s1735_s9 }
 0x496   : > { %v1109_v36 = vpop.f32.mrf.mxu2  ;;  %v1142_v37 = vpop.f32.mrf.mxu3 }
 0x497   : > { %1156 = vrot.lane.b32.xlu0 %v1142_v37, %s1735_s9 }
 0x49e   : > { %v1144_v40 = vpop.f32.mrf.mxu3 }
 0x4a3   : > { %v1067_v62 = vpop.permute.xlu1 %1066 }
 0x4a4   : > { %v1069_v39 = vadd.f32 %v1067_v62, %v1064_v61 }
 0x4a6   : > { %1070 = vst.msk [vmem:[%s1884_s7 + $0x8] sm:$0xff] %vm1062_vm13, %v1069_v39 }
 0x4ad   : > { %v1154_v44 = vld [vmem:[%s1884_s7 + $0x8] sm:$0xff] }
 0x501   : > { %v1149_v42 = vpop.permute.xlu0 %1148 }
 0x502   : > { %v1151_v43 = vadd.f32 %v1149_v42, %v1146_v41 }
 0x504   : > { %1153 = vst.msk [vmem:[%s1884_s7] sm:$0xff] %vm1152_vm14, %v1151_v43 }
 0x509   : > { %v1157_v45 = vpop.permute.xlu0 %1156 }
 0x50a   : > { %v1159_v46 = vadd.f32 %v1157_v45, %v1154_v44 }
 0x50c   : > { %1160 = vst.msk [vmem:[%s1884_s7 + $0x8] sm:$0xff] %vm1152_vm14, %v1159_v46 }
 0x50d PF: > { %p1429_p3 = scmp.ne.s32.totalorder %s1705_s25, 1 }
 0x50f   : > { %1164 = sbr.rel (%p1429_p3) target bundleno = 1306 (0x51a), region = 44 }
 0x514   : > { %v1165_v18 = vld [vmem:[%s1884_s7] sm:$0xff]  ;;  %v1166_v47 = vld [vmem:[%s1884_s7 + $0x8] sm:$0xff]  ;;  %vm1173_vm15 = vcmask 516096  }
 0x515   : > { %v1171_v48 = vld [vmem:[%s1887_s29] sm:$0x1]  ;;  %v1167_v12 = vmul.f32 0.35355338, %v1165_v18  ;;  %v1168_v49 = vmul.f32 0.35355338, %v1166_v47 }
 0x516   : > { %v1172_v50 = vmul.f32 0.35355338, %v1171_v48 }
 0x517   : > { %1169 = vst [vmem:[%s1884_s7] sm:$0xff] %v1167_v12 }
 0x518   : > { %1170 = vst [vmem:[%s1884_s7 + $0x8] sm:$0xff] %v1168_v49 }
 0x519   : > { %1174 = vst.msk [vmem:[%s1887_s29] sm:$0x1] %vm1173_vm15, %v1172_v50 }
 0x51a PF: > { %s1431_s25 = sshll.u32 %s1713_s0, 1  ;;  %s1194_s1 = sshll.u32 %s1884_s7, 4  ;;  %s1195_s1 = int_to_ptr.vmem [resolvable:$true] %s1194_s1 }
 0x51b   : > { %s1188_s16 = sadd.s32 %s1709_s26, %s1431_s25  ;;  %s1176_s6 = scalar_lea.sflag [#allocation5], %s1868_s20 }
 0x51c   : > { %s1453_s28 = sshll.u32 %s1188_s16, 4  ;;  %s1605_s26 = scalar_lea.hbm %s2198_s4, 64 }
 0x51d   : > { %s1193_s17 = scalar_lea.hbm %s2198_s4, %s1453_s28 }
 0x51e   : > { %s1196_s18 = sshll.u32 %s1193_s17, 4  ;;  %s1197_s18 = int_to_ptr.hbm [resolvable:$true] %s1196_s18 }
 0x51f   : > { %s1599_s8 = sshra.s32 %s1197_s18, 4  ;;  %s1600_s8 = int_to_ptr.hbm [resolvable:$true] %s1599_s8 }
 0x520   : > { %s1601_s9 = scalar_lea.hbm %s1600_s8, 16  ;;  %p1606_p9 = scmp.lt.s32.totalorder %s1600_s8, %s2198_s4 }
 0x521   : > { %p1602_p4 = scmp.ne.s32.totalorder %s1600_s8, %s1601_s9  ;;  %p1607_p10 = scmp.lt.s32.totalorder %s1605_s26, %s1601_s9 }
 0x523   : > { %p1603_p5 = pnand %p1602_p4, %p1848_p6  ;;  %p1608_p11 = por %p1607_p10, %p1606_p9 }
 0x525   : > { %p1604_p8 = pneg %p1603_p5 }
 0x527   : > { %p1609_p12 = pnand %p1608_p11, %p1604_p8 }
 0x529   : > { %1612 = shalt.err (!%p1609_p12)
}
 0x52a   : > { %s1747_s14 = smov 128   ;;  %s1748_s15 = smov 8  }
 0x52b   : > { %1454 = dma.vmem_to_hbm [thread:$0]  (%p1848_p6), %s1195_s1, 256, %s1197_s18, %s1176_s6, %s1747_s14, %s1747_s14, %s1748_s15  }
 0x52c   : > { %s1210_s21 = scalar_lea.hbm %s2199_s5, %s1188_s16  ;;  %s1212_s27 = sshll.u32 %s1887_s29, 4  ;;  %s1213_s27 = int_to_ptr.vmem [resolvable:$true] %s1212_s27 }
 0x52d   : > { %s1214_s17 = sshll.u32 %s1210_s21, 4  ;;  %s1181_s8 = scalar_lea.sflag [#allocation7], %s1868_s20  ;;  %s1215_s17 = int_to_ptr.hbm [resolvable:$true] %s1214_s17 }
 0x52e   : > { %s1627_s9 = sshra.s32 %s1215_s17, 4  ;;  %s1633_s1 = scalar_lea.hbm %s2199_s5, 4  ;;  %s1628_s9 = int_to_ptr.hbm [resolvable:$true] %s1627_s9 }
 0x52f   : > { %s1629_s10 = scalar_lea.hbm %s1628_s9, 1  ;;  %p1634_p2 = scmp.lt.s32.totalorder %s1628_s9, %s2199_s5 }
 0x530   : > { %p1630_p13 = scmp.ne.s32.totalorder %s1628_s9, %s1629_s10  ;;  %p1635_p3 = scmp.lt.s32.totalorder %s1633_s1, %s1629_s10 }
 0x532   : > { %p1631_p0 = pnand %p1630_p13, %p1848_p6  ;;  %p1636_p4 = por %p1635_p3, %p1634_p2 }
 0x534   : > { %p1632_p1 = pneg %p1631_p0 }
 0x536   : > { %p1637_p5 = pnand %p1636_p4, %p1632_p1 }
 0x538   : > { %1640 = shalt.err (!%p1637_p5)
}
 0x539   : > { %1455 = dma.vmem_to_hbm [thread:$0]  (%p1848_p6), %s1213_s27, 16, %s1215_s17, %s1181_s8  }
 0x53a PF: > { %p1465_p8 = scmp.ge.s32.totalorder %s1729_s30, 2  ;;  %s1226_s29 = sand.u32 1, %s1693_s22  }
 0x53b   : > { %s1227_s20 = scalar_lea.sflag [#allocation5], %s1226_s29 }
 0x53c   : > { %p1459_p9 = pnand %p1465_p8, %p1852_p7 }
 0x53e   : > { %p1460_p10 = pneg %p1459_p9 }
 0x540   : > { %1684 = dma.done.wait (%p1460_p10), %s1227_s20, 256  }
 0x541   : > { %1686 = vsyncadd (%p1460_p10), %s1227_s20, 4294967040  ;;  %s1237_s16 = scalar_lea.sflag [#allocation7], %s1226_s29 }
 0x542   : > { %1688 = dma.done.wait (%p1460_p10), %s1237_s16, 16  }
 0x543   : > { %1690 = vsyncadd (%p1460_p10), %s1237_s16, 4294967280  ;;  %s30_s30 = sadd.s32 1, %s1729_s30   ;;  %s2217_s25 = sld [smem:[#allocation11_spill]] }
 0x544   : > { %p27_p11 = scmp.ge.s32.totalorder %s30_s30, 10   ;;  %s2218_s26 = sld [smem:[#allocation12_spill]] }
 0x545   : > { %s2219_s0 = sld [smem:[#allocation13_spill]]  ;;  %s2223_s22 = smov %s1697_s23 }
 0x546   : > { %s2220_s27 = sld [smem:[#allocation14_spill]]  ;;  %s2224_s23 = smov %s1701_s24 }
 0x547   : > { %s2221_s28 = sld [smem:[#allocation15_spill]]  ;;  %s2225_s24 = smov %s1865_s19 }
 0x548   : > { %s2222_s29 = sld [smem:[#allocation16_spill]]  ;;  %29 = sbr.rel (!%p27_p11) target bundleno = 14 (0xe), region = 96 }
 0x54d   :  { %1242 = vsyncpa [#allocation5], 1 }
 0x54e   :  { %1244 = vsyncpa [#allocation5 + $0x1], 1 }
 0x54f   :  { %1245 = vsyncpa [#allocation7], 1 }
 0x550   :  { %1247 = vsyncpa [#allocation7 + $0x1], 1 }

// kernel: tpu_custom_call.1
= control target key start
LH: loop header
LB: loop body
LE: loop exit
PB: predicated region body
PF: predicated region fallthrough
CT: control target
= control target key end

     0   :  { %s1731_s21 = smov [#allocation3]   ;;  %s2194_s0 = inlined_call_operand.vmem [shape: s32[2], index: 0, kind: input, shape index: {}]   ;;  %s2195_s1 = inlined_call_operand.vmem [shape: f32[32,256], index: 1, kind: input, shape index: {}]   ;;  %s2196_s2 = inlined_call_operand.vmem [shape: bf16[128,160], index: 2, kind: input, shape index: {}]   ;;  %s2197_s3 = inlined_call_operand.vmem [shape: f32[1,160], index: 3, kind: input, shape index: {}]   ;;  %s2198_s4 = inlined_call_operand.hbm [shape: f32[4,16,128], index: 4, kind: output, shape index: {0}]   ;;  %s2199_s5 = inlined_call_operand.hbm [shape: f32[4,1,64], index: 5, kind: output, shape index: {1}]  }
   0x1   :  { %2206 = sst [smem:[#allocation17_spill]] %s2195_s1  ;;  %s12_s20 = sshll.u32 %s2194_s0, 4  ;;  %s13_s20 = int_to_ptr.vmem [resolvable:$true] %s12_s20 }
   0x2   :  { %15 = dma.vmem_to_smem %s13_s20, 16, %s1731_s21, [#allocation2] }
   0x3   :  { %1681 = dma.done.wait [#allocation2], 16 }
   0x4   :  { %1682 = vsyncadd [#allocation2], 4294967280 }
   0x5   :  { %18 = sfence }
   0x6   :  { %19 = vsyncpa [#allocation5], 0 }
   0x7   :  { %21 = vsyncpa [#allocation5 + $0x1], 0 }
   0x8   :  { %22 = vsyncpa [#allocation7], 0 }
   0x9   :  { %24 = vsyncpa [#allocation7 + $0x1], 0  ;;  %s1782_s22 = smov 0   ;;  %s1784_s23 = smov 0  }
   0xa   :  { %s1786_s24 = smov 0   ;;  %s1788_s25 = smov 0  }
   0xb   :  { %s1790_s26 = smov 0   ;;  %s1792_s0 = smov 0  }
   0xc   :  { %s1794_s27 = smov 0   ;;  %s1796_s28 = smov 0  }
   0xd   :  { %s1798_s29 = smov 0   ;;  %s1800_s30 = smov 0  }
   0xe LB: > { %2207 = sst [smem:[#allocation11_spill]] %s1717_s27  ;;  %s1329_s6 = sadd.s32 4294967295, %s1729_s30   ;;  %s1729_s30 = sphi %s1800_s30, %s30_s30   ;;  %s1725_s29 = sphi %s1798_s29, %s2222_s29   ;;  %s1721_s28 = sphi %s1796_s28, %s2221_s28   ;;  %s1717_s27 = sphi %s1794_s27, %s2220_s27   ;;  %s1713_s0 = sphi %s1792_s0, %s2219_s0   ;;  %s1709_s26 = sphi %s1790_s26, %s2218_s26   ;;  %s1705_s25 = sphi %s1788_s25, %s2217_s25   ;;  %s1701_s24 = sphi %s1786_s24, %s2225_s24   ;;  %s1697_s23 = sphi %s1784_s23, %s2224_s23   ;;  %s1693_s22 = sphi %s1782_s22, %s2223_s22  }
   0xf   : > { %2208 = sst [smem:[#allocation12_spill]] %s1721_s28  ;;  %s42_s7 = sadd.s32 1, %s1717_s27 }
  0x10   : > { %2209 = sst [smem:[#allocation13_spill]] %s1725_s29  ;;  %p43_p0 = scmp.ge.s32.totalorder %s42_s7, 2 }
  0x11   : > { %s45_s8 = sadd.s32 1, %s1721_s28  ;;  %s1330_s9 = sadd.s32 4294967294, %s1729_s30  }
  0x12   : > { %s49_s10 = sadd.s32 1, %s1725_s29  ;;  %s2227_s7 = smov (%p43_p0, %s42_s7), 0 }
  0x13   : > { %2210 = sst [smem:[#allocation14_spill]] %s2227_s7  ;;  %s2229_s8 = smov (!%p43_p0, %s45_s8), %s1721_s28 }
  0x14   : > { %s1333_s11 = sshll.u32 %s1725_s29, 1  ;;  %p144_p1 = scmp.ne.s32.totalorder %s1701_s24, %s1697_s23 }
  0x15   : > { %p47_p2 = scmp.ge.s32.totalorder %s2229_s8, 2  ;;  %p145_p3 = scmp.eq.s32.totalorder %s1329_s6, 7 }
  0x16   : > { %p150_p4 = scmp.ne.s32.totalorder %s1697_s23, %s1693_s22  ;;  %p151_p5 = scmp.eq.s32.totalorder %s1330_s9, 7 }
  0x17   : > { %s2231_s8 = smov (%p47_p2, %s2229_s8), 0  ;;  %s2233_s10 = smov (!%p47_p2, %s49_s10), %s1725_s29 }
  0x18   : > { %2211 = sst [smem:[#allocation15_spill]] %s2231_s8  ;;  %p1848_p6 = por %p145_p3, %p144_p1 }
  0x19   : > { %p1852_p7 = por %p151_p5, %p150_p4  ;;  %p51_p8 = scmp.ge.s32.totalorder %s2233_s10, 2 }
  0x1a   : > { %p1339_p9 = scmp.ge.s32.totalorder %s1729_s30, 1  ;;  %p220_p10 = scmp.lt.s32.totalorder %s1729_s30, 9 }
  0x1b   : > { %s2235_s10 = smov (%p51_p8, %s2233_s10), 0  ;;  %s128_s14 = sadd.s32 %s1721_s28, %s1333_s11 }
  0x1c   : > { %2214 = sst [smem:[#allocation16_spill]] %s2235_s10  ;;  %p221_p11 = pnand %p1339_p9, %p220_p10 }
  0x1d   : > { %s1334_s15 = sshll.u32 %s2235_s10, 1  ;;  %s134_s18 = sadd.s32 1, %s1701_s24 }
  0x1e   : > { %s130_s16 = sadd.s32 %s1334_s15, %s2231_s8  ;;  %224 = sbr.rel (%p221_p11) target bundleno = 1338 (0x53a), region = 32 }
  0x1f   : > { %s131_s17 = ssub.s32 %s128_s14, %s130_s16  ;;  %s1868_s20 = sand.u32 (!%p221_p11), 1, %s1697_s23  }
  0x20   : > { %p132_p12 = scmp.eq.s32.totalorder %s131_s17, 0  ;;  %s1341_s21 = sshll.u32 (!%p221_p11), %s1709_s26, 1 }
  0x21   : > { %s1340_s6 = sshll.u32 (!%p221_p11), %s1868_s20, 4  ;;  %s1873_s9 = sadd.s32 (!%p221_p11), %s1705_s25, %s1341_s21 }
  0x22   : > { %s1865_s19 = scalar_select %p132_p12, %s1701_s24, %s134_s18  }
  0x23   : > { %p257_p13 = scmp.lt.s32.totalorder %s1873_s9, 3  ;;  %p259_p0 = scmp.lt.s32.totalorder %s1713_s0, 1 }
  0x24   : > { %s2215_s1 = sld [smem:[#allocation17_spill]]  ;;  %s1884_s7 = scalar_lea.vmem [#allocation4], %s1340_s6 }
  0x25   : > { %s258_s11 = scalar_select %p257_p13, %s1873_s9, 3 }
  0x26   : > { %s260_s14 = scalar_select %p259_p0, %s1713_s0, 1 }
  0x27   : > { %s1342_s15 = sshll.u32 %s258_s11, 1  ;;  %s1887_s29 = scalar_lea.vmem [#allocation6], %s1868_s20 }
  0x28   : > { %s262_s16 = sadd.s32 %s1342_s15, %s260_s14  ;;  %p1344_p1 = scmp.ne.s32.totalorder %s1705_s25, 0 }
  0x29   : > { %s1343_s17 = sshll.u32 %s262_s16, 3 }
  0x2a   : > { %s1882_s8 = scalar_lea.vmem %s2215_s1, %s1343_s17  ;;  %275 = sbr.rel (%p1344_p1) target bundleno = 51 (0x33), region = 36 }
  0x2f   : > { %vm278_vm0 = vcmask 516096   ;;  %v1732_v0 = vmov 0.0  }
  0x30   : > { %276 = vst [vmem:[%s1884_s7] sm:$0xff] %v1732_v0 }
  0x31   : > { %277 = vst [vmem:[%s1884_s7 + $0x8] sm:$0xff] %v1732_v0 }
  0x32   : > { %279 = vst.msk [vmem:[%s1887_s29] sm:$0x1] %vm278_vm0, %v1732_v0 }
  0x33 PF: > { %s1894_s10 = sld [smem:[#allocation3 + %s1713_s0]]  ;;  %s2204_s21 = sshll.u32 %s1873_s9, 3 }
  0x39   : > { %p1347_p2 = scmp.ge.s32.totalorder %s2204_s21, %s1894_s10 }
  0x3a   : > { %s2216_s17 = sshll.u32 (!%p1347_p2), %s1873_s9, 3  ;;  %s1735_s9 = smov (!%p1347_p2), 96  }
  0x3b   : > { %287 = sbr.rel (%p1347_p2) target bundleno = 1293 (0x50d), region = 40  ;;  %s1744_s11 = smov (!%p1347_p2), 112  }
  0x3c   : > { %s1745_s14 = smov (!%p1347_p2), 104   ;;  %s1746_s15 = smov (!%p1347_p2), 32  }
  0x40   : > { %v1406_v1 = vld [vmem:[%s2196_s2 + $0x70] sm:$0xf]  ;;  %v1452_v2 = vld [vmem:[%s2196_s2 + $0x74] sm:$0xf0]  ;;  %v1451_v3 = vld [vmem:[%s2196_s2 + $0x74] sm:$0xf]  ;;  %v418_v51 = vlaneseq  ;;  %v420_v53 = vstv %s2216_s17 }
  0x41   : > { %v1407_v4 = vor.u32 %v1452_v2, %v1406_v1  ;;  %v1408_v5 = vld [vmem:[%s2196_s2 + $0x78] sm:$0xf0]  ;;  %v1398_v6 = vld [vmem:[%s2196_s2 + $0x60] sm:$0xf]  ;;  %v1450_v7 = vld [vmem:[%s2196_s2 + $0x64] sm:$0xf0]  ;;  %v422_v56 = vstv %s1894_s10 }
  0x42   : > { %v1411_v8 = vor.u32 %v1451_v3, %v1408_v5  ;;  %v1449_v9 = vld [vmem:[%s2196_s2 + $0x64] sm:$0xf]  ;;  %v1400_v10 = vld [vmem:[%s2196_s2 + $0x68] sm:$0xf0]  ;;  %v1399_v11 = vor.u32 %v1450_v7, %v1398_v6  ;;  %v1390_v13 = vld [vmem:[%s2196_s2 + $0x50] sm:$0xf] }
  0x43   : > { %392 = vmatpush.bf16.msra.mxu0 %v1407_v4  ;;  %v1403_v12 = vor.u32 %v1449_v9, %v1400_v10  ;;  %v1448_v14 = vld [vmem:[%s2196_s2 + $0x54] sm:$0xf0]  ;;  %v1447_v15 = vld [vmem:[%s2196_s2 + $0x54] sm:$0xf]  ;;  %v1392_v16 = vld [vmem:[%s2196_s2 + $0x58] sm:$0xf0] }
  0x44   : > { %405 = vmatpush.bf16.msra.mxu1 %v1411_v8  ;;  %v1391_v17 = vor.u32 %v1448_v14, %v1390_v13  ;;  %v1395_v18 = vor.u32 %v1447_v15, %v1392_v16  ;;  %v1382_v19 = vld [vmem:[%s2196_s2 + $0x40] sm:$0xf]  ;;  %v1446_v20 = vld [vmem:[%s2196_s2 + $0x44] sm:$0xf0]  ;;  %v1445_v21 = vld [vmem:[%s2196_s2 + $0x44] sm:$0xf] }
  0x45   : > { %v1384_v22 = vld [vmem:[%s2196_s2 + $0x48] sm:$0xf0]  ;;  %v1383_v23 = vor.u32 %v1446_v20, %v1382_v19  ;;  %v1374_v25 = vld [vmem:[%s2196_s2 + $0x30] sm:$0xf]  ;;  %v1444_v26 = vld [vmem:[%s2196_s2 + $0x34] sm:$0xf0] }
  0x46   : > { %v1387_v24 = vor.u32 %v1445_v21, %v1384_v22  ;;  %v1443_v27 = vld [vmem:[%s2196_s2 + $0x34] sm:$0xf]  ;;  %v1376_v28 = vld [vmem:[%s2196_s2 + $0x38] sm:$0xf0]  ;;  %v1375_v29 = vor.u32 %v1444_v26, %v1374_v25  ;;  %v1366_v31 = vld [vmem:[%s2196_s2 + $0x20] sm:$0xf] }
  0x47   : > { %393 = vmatpush.bf16.msra.mxu0 %v1399_v11  ;;  %v1379_v30 = vor.u32 %v1443_v27, %v1376_v28  ;;  %v1442_v32 = vld [vmem:[%s2196_s2 + $0x24] sm:$0xf0]  ;;  %v1441_v33 = vld [vmem:[%s2196_s2 + $0x24] sm:$0xf]  ;;  %v1368_v34 = vld [vmem:[%s2196_s2 + $0x28] sm:$0xf0] }
  0x48   : > { %406 = vmatpush.bf16.msra.mxu1 %v1403_v12  ;;  %v1367_v35 = vor.u32 %v1442_v32, %v1366_v31  ;;  %v1371_v36 = vor.u32 %v1441_v33, %v1368_v34  ;;  %v1358_v37 = vld [vmem:[%s2196_s2 + $0x10] sm:$0xf]  ;;  %v1440_v38 = vld [vmem:[%s2196_s2 + $0x14] sm:$0xf0]  ;;  %v1439_v39 = vld [vmem:[%s2196_s2 + $0x14] sm:$0xf] }
  0x49   : > { %v1360_v40 = vld [vmem:[%s2196_s2 + $0x18] sm:$0xf0]  ;;  %v1359_v41 = vor.u32 %v1440_v38, %v1358_v37  ;;  %v1350_v43 = vld [vmem:[%s2196_s2] sm:$0xf]  ;;  %v1438_v44 = vld [vmem:[%s2196_s2 + $0x4] sm:$0xf0] }
  0x4a   : > { %v1363_v42 = vor.u32 %v1439_v39, %v1360_v40  ;;  %v1437_v45 = vld [vmem:[%s2196_s2 + $0x4] sm:$0xf]  ;;  %v1352_v46 = vld [vmem:[%s2196_s2 + $0x8] sm:$0xf0]  ;;  %v1351_v47 = vor.u32 %v1438_v44, %v1350_v43  ;;  %v419_v52 = vshrl.u32 %v418_v51, 7  ;;  %v1733_v60 = vmov 0.0  }
  0x4b   : > { %394 = vmatpush.bf16.msra.mxu0 %v1391_v17  ;;  %v288_v48 = vld [vmem:[%s1882_s8] sm:$0xff]  ;;  %v1355_v49 = vor.u32 %v1437_v45, %v1352_v46  ;;  %s1734_s8 = smov 64   ;;  %v1736_v19 = vmov 2102212464   ;;  %v1737_v21 = vmov 920167782  }
  0x4c   : > { %407 = vmatpush.bf16.msra.mxu1 %v1395_v18  ;;  %v289_v50 = vpack.c.bf16 %v288_v48, %v288_v48  ;;  %v421_v54 = vadd.s32 %v420_v53, %v419_v52  ;;  %v306_v55 = vld [vmem:[%s2197_s3] sm:$0x3]  ;;  %v1739_v26 = vmov 683565275   ;;  %v1740_v28 = vmov 2475754826  }
  0x4d   : > { %v308_v57 = vperm.slane %v306_v55, 0  ;;  %v309_v58 = vperm.slane %v306_v55, 1  ;;  %v1741_v31 = vmov 2131351028   ;;  %s1743_s10 = smov 120  }
  0x4e   : > { %vm423_vm1 = vcmp.lt.s32.totalorder %v421_v54, %v422_v56 }
  0x4f   : > { %395 = vmatpush.bf16.msra.mxu0 %v1383_v23  ;;  %v2003_v61 = vsel %vm423_vm1, 1.0, %v1733_v60 }
  0x50   : > { %408 = vmatpush.bf16.msra.mxu1 %v1387_v24  ;;  %v1738_v24 = vmov 1326507024  }
  0x53   : > { %396 = vmatpush.bf16.msra.mxu0 %v1375_v29 }
  0x54   : > { %409 = vmatpush.bf16.msra.mxu1 %v1379_v30 }
  0x57   : > { %397 = vmatpush.bf16.msra.mxu0 %v1367_v35 }
  0x58   : > { %410 = vmatpush.bf16.msra.mxu1 %v1371_v36 }
  0x5b   : > { %398 = vmatpush.bf16.msra.mxu0 %v1359_v41 }
  0x5c   : > { %411 = vmatpush.bf16.msra.mxu1 %v1363_v42 }
  0x5f   : > { %399 = vmatpush.bf16.msra.mxu0 %v1351_v47 }
  0x60   : > { %412 = vmatpush.bf16.msra.mxu1 %v1355_v49 }
  0x62   : > { %400 = vmatmul.bf16.vlgmr.msra.gmra.mxu0 %v289_v50 }
  0x63   : > { %413 = vmatmul.bf16.vlgmr.msra.gmra.mxu1 %v289_v50 }
  0xdf   : > { %v401_v59 = vpop.f32.mrf.mxu0 }
  0xe0   : > { %v2005_v62 = vadd.f32 %v401_v59, %v308_v57  ;;  %v414_v63 = vpop.f32.mrf.mxu1 }
  0xe1   : > { %v415_v0 = vadd.f32 %v414_v63, %v309_v58 }
  0xe2   : > { %v433_v1 = vand.u32 2139095040, %v2005_v62  ;;  %v427_v2 = vmul.f32 %v2003_v61, %v2005_v62  ;;  %v430_v7 = vand.u32 2147483647, %v2005_v62  ;;  %vm432_vm14 = vcmp.lt.s32.totalorder %v2005_v62, 0 }
  0xe3   : > { %v428_v3 = vmul.f32 %v2003_v61, %v415_v0 }
  0xe4   : > { %v434_v4 = vshrl.u32 %v433_v1, 23  ;;  %v437_v13 = vand.u32 8388607, %v430_v7  ;;  %vm431_vm15 = vcmp.le.f32.partialorder %v430_v7, 0.7853982 }
  0xe5   : > { %v2011_v5 = vpack.c.bf16 %v428_v3, %v427_v2 }
  0xe6   : > { %v1413_v6 = vadd.s32 4294967169, %v434_v4  ;;  %v438_v17 = vor.u32 8388608, %v437_v13 }
  0xe7   : > { %v403_v8 = vpop.f32.mrf.mxu0  ;;  %v823_v9 = vunpack.c.l.b16 %v2011_v5 }
  0xe8   : > { %v440_v10 = vadd.s32 1, %v1413_v6  ;;  %v416_v11 = vpop.f32.mrf.mxu1  ;;  %v2032_v38 = vshll.u32 %v438_v17, 8 }
  0xe9   : > { %v2015_v12 = vpack.c.b16 %v823_v9, %v823_v9  ;;  %v1742_v9 = vmov 0  }
  0xea   : > { %vm441_vm2 = vcmp.gt.s32.totalorder %v440_v10, 0  ;;  %v479_v48 = vand.u32 65535, %v2032_v38  ;;  %v480_v50 = vshrl.u32 %v2032_v38, 16 }
  0xeb   : > { %v442_v14 = vsel %vm441_vm2, %v440_v10, 0  ;;  %907 = vrot.lane.b32.xlu2 %v2015_v12, %s1734_s8  ;;  %825 = vrot.lane.b32.xlu1 %v2015_v12, %s1735_s9 }
  0xec   : > { %v444_v15 = vand.u32 31, %v442_v14  ;;  %v2025_v18 = vshrl.u32 %v442_v14, 5 }
  0xee   : > { %v2023_v16 = vsub.s32 32, %v444_v15  ;;  %v456_v20 = vshll.u32 %v1736_v19, %v444_v15  ;;  %v459_v22 = vshll.u32 %v1737_v21, %v444_v15  ;;  %v447_v27 = vshll.u32 %v1739_v26, %v444_v15 }
  0xef   : > { %v450_v30 = vshll.u32 %v1740_v28, %v444_v15  ;;  %v453_v33 = vshll.u32 %v1741_v31, %v444_v15  ;;  %vm465_vm3 = vcmp.lt.s32.totalorder %v2025_v18, 4  ;;  %vm462_vm4 = vcmp.lt.s32.totalorder %v2025_v18, 1 }
  0xf0   : > { %v457_v23 = vshrl.u32 %v1737_v21, %v2023_v16  ;;  %v460_v25 = vshrl.u32 %v1738_v24, %v2023_v16  ;;  %v448_v29 = vshrl.u32 %v1740_v28, %v2023_v16  ;;  %v451_v32 = vshrl.u32 %v1741_v31, %v2023_v16 }
  0xf1   : > { %v454_v34 = vshrl.u32 %v1736_v19, %v2023_v16  ;;  %vm464_vm5 = vcmp.lt.s32.totalorder %v2025_v18, 3  ;;  %vm463_vm6 = vcmp.lt.s32.totalorder %v2025_v18, 2  ;;  %v446_v15 = vshrl.u32 %v1739_v26, %v2023_v16 }
  0xf2   : > { %v458_v35 = vor.u32 %v457_v23, %v456_v20  ;;  %v461_v36 = vor.u32 %v460_v25, %v459_v22  ;;  %v449_v37 = vor.u32 %v448_v29, %v447_v27  ;;  %v452_v39 = vor.u32 %v451_v32, %v450_v30 }
  0xf3   : > { %v455_v40 = vor.u32 %v454_v34, %v453_v33 }
  0xf4   : > { %v471_v41 = vsel %vm465_vm3, %v458_v35, 920167782  ;;  %v475_v42 = vsel %vm465_vm3, %v461_v36, 1326507024  ;;  %v470_v43 = vsel %vm462_vm4, %v449_v37, %v452_v39  ;;  %v466_v23 = vsel %vm462_vm4, %v446_v15, %v449_v37 }
  0xf5   : > { %v472_v44 = vsel %vm464_vm5, %v455_v40, %v471_v41  ;;  %v474_v45 = vsel %vm462_vm4, %v452_v39, %v455_v40  ;;  %v476_v47 = vsel %vm464_vm5, %v458_v35, %v475_v42  ;;  %v467_v11 = vsel %vm465_vm3, %v455_v40, 2102212464 }
  0xf6   : > { %v473_v46 = vsel %vm463_vm6, %v470_v43, %v472_v44  ;;  %v477_v49 = vsel %vm463_vm6, %v474_v45, %v476_v47  ;;  %v468_v24 = vsel %vm464_vm5, %v452_v39, %v467_v11 }
  0xf7   : > { %v503_v51 = vand.u32 65535, %v473_v46  ;;  %v504_v52 = vshrl.u32 %v473_v46, 16  ;;  %v481_v53 = vand.u32 65535, %v477_v49  ;;  %v482_v54 = vshrl.u32 %v477_v49, 16 }
  0xf8   : > { %v469_v16 = vsel %vm463_vm6, %v466_v23, %v468_v24  ;;  %vm573_vm6 = vweird.f32 %v2005_v62 }
  0xf9   : > { %v506_v55 = vmul.u32 %v504_v52, %v479_v48  ;;  %v507_v56 = vmul.u32 %v503_v51, %v480_v50  ;;  %v484_v57 = vmul.u32 %v482_v54, %v479_v48  ;;  %v485_v58 = vmul.u32 %v481_v53, %v480_v50 }
  0xfa   : > { %v505_v59 = vmul.u32 %v503_v51, %v479_v48  ;;  %v483_v63 = vmul.u32 %v481_v53, %v479_v48  ;;  %v508_v1 = vmul.u32 %v504_v52, %v480_v50  ;;  %v486_v2 = vmul.u32 %v482_v54, %v480_v50 }
  0xfb   : > { %v509_v60 = vshll.u32 %v506_v55, 16  ;;  %v487_v0 = vshll.u32 %v484_v57, 16  ;;  %v511_v3 = vshll.u32 %v507_v56, 16  ;;  %v489_v6 = vshll.u32 %v485_v58, 16 }
  0xfc   : > { %v510_v21 = vshrl.u32 %v506_v55, 16  ;;  %v488_v25 = vshrl.u32 %v484_v57, 16  ;;  %v512_v28 = vshrl.u32 %v507_v56, 16  ;;  %v490_v30 = vshrl.u32 %v485_v58, 16 }
  0xfd   : > { %vm513_vm7 = vc.u32 %v505_v59, %v509_v60  ;;  %v515_v4 = vadd.s32 %v509_v60, %v505_v59  ;;  %vm491_vm8 = vc.u32 %v483_v63, %v487_v0  ;;  %v493_v8 = vadd.s32 %v487_v0, %v483_v63 }
  0xfe   : > { %v514_v10 = vsel %vm513_vm7, 1, %v1742_v9  ;;  %v492_v13 = vsel %vm491_vm8, 1, %v1742_v9  ;;  %v523_v35 = vmul.u32 %v2032_v38, %v469_v16  ;;  %vm761_vm7 = vcmask 1043456  }
  0xff   : > { %v516_v14 = vadd.s32 %v514_v10, %v508_v1  ;;  %vm517_vm9 = vc.u32 %v515_v4, %v511_v3  ;;  %v494_v17 = vadd.s32 %v492_v13, %v486_v2  ;;  %vm495_vm10 = vc.u32 %v493_v8, %v489_v6 }
 0x100   : > { %v518_v19 = vsel %vm517_vm9, 1, %v1742_v9  ;;  %v496_v20 = vsel %vm495_vm10, 1, %v1742_v9  ;;  %v519_v33 = vadd.s32 %v515_v4, %v511_v3  ;;  %vm757_vm8 = vcmask 64512  }
 0x101   : > { %v520_v22 = vadd.s32 %v518_v19, %v516_v14  ;;  %v498_v27 = vadd.s32 %v496_v20, %v494_v17  ;;  %vm796_vm9 = vcmask 253952   ;;  %vm880_vm10 = vcmask 261120  }
 0x103   : > { %v521_v29 = vadd.s32 %v520_v22, %v510_v21  ;;  %v499_v31 = vadd.s32 %v498_v27, %v488_v25 }
 0x105   : > { %v522_v26 = vadd.s32 %v521_v29, %v512_v28  ;;  %v500_v32 = vadd.s32 %v499_v31, %v490_v30  ;;  %v426_v30 = vpack.c.bf16 %v2003_v61, %v2003_v61 }
 0x107   : > { %v526_v34 = vadd.s32 1, %v522_v26  ;;  %vm525_vm11 = vc.u32 %v500_v32, %v519_v33  ;;  %v524_v47 = vadd.s32 %v519_v33, %v500_v32 }
 0x109   : > { %v527_v36 = vsel %vm525_vm11, %v526_v34, %v522_v26  ;;  %vm804_vm11 = vcmask 516352  }
 0x10a   : > { %v528_v37 = vadd.s32 %v527_v36, %v523_v35 }
 0x10c   : > { %v529_v40 = vadd.s32 536870912, %v528_v37 }
 0x10e   : > { %v530_v39 = vshrl.u32 %v529_v40, 30 }
 0x110   : > { %v531_v41 = vshll.u32 %v530_v39, 30  ;;  %v554_v60 = vsub.s32 4, %v530_v39 }
 0x112   : > { %v532_v42 = vsub.s32 %v528_v37, %v531_v41  ;;  %v555_v3 = vsel %vm432_vm14, %v554_v60, %v530_v39  ;;  %v878_v60 = vld [vmem:[%s1884_s7] sm:$0xff] }
 0x113   : > { %v557_v8 = vsel %vm431_vm15, 0, %v555_v3 }
 0x114   : > { %vm533_vm12 = vcmp.lt.s32.totalorder %v532_v42, 0  ;;  %v534_v43 = vsub.s32 0, %v532_v42  ;;  %v574_v14 = vadd.s32 3, %v557_v8  ;;  %v730_v20 = vand.u32 3, %v557_v8 }
 0x116   : > { %v535_v44 = vsel %vm533_vm12, %v534_v43, %v532_v42  ;;  %v575_v21 = vand.u32 3, %v574_v14  ;;  %vm731_vm0 = vcmp.lt.s32.totalorder %v730_v20, 2  ;;  %vm732_vm1 = vcmp.eq.s32.totalorder %v730_v20, 0 }
 0x117   : > { %v536_v45 = vclz %v535_v44  ;;  %vm735_vm5 = vcmp.eq.s32.totalorder %v730_v20, 2  ;;  %vm972_vm12 = vcmask 523520  }
 0x118   : > { %vm576_vm2 = vcmp.lt.s32.totalorder %v575_v21, 2  ;;  %vm577_vm3 = vcmp.eq.s32.totalorder %v575_v21, 0  ;;  %vm580_vm4 = vcmp.eq.s32.totalorder %v575_v21, 2 }
 0x119   : > { %v1414_v46 = vadd.s32 4294967294, %v536_v45 }
 0x11b   : > { %vm1415_vm13 = vcmp.lt.s32.totalorder %v1414_v46, 0 }
 0x11c   : > { %v539_v18 = vsel %vm1415_vm13, 0, %v1414_v46  ;;  %v1090_v46 = vunpack.c.h.b16 %v2011_v5  ;;  %vm1062_vm13 = vcmask 785920  }
 0x11d   : > { %v540_v48 = vsub.s32 32, %v539_v18  ;;  %v544_v49 = vsub.s32 4294967266, %v539_v18  ;;  %v541_v50 = vshll.u32 %v532_v42, %v539_v18 }
 0x11e   : > { %v1091_v18 = vpack.c.b16 %v1090_v46, %v1090_v46 }
 0x11f   : > { %v542_v51 = vshrl.u32 %v524_v47, %v540_v48  ;;  %v545_v38 = vadd.s32 127, %v544_v49 }
 0x121   : > { %v543_v52 = vor.u32 %v542_v51, %v541_v50  ;;  %v546_v53 = vshll.u32 %v545_v38, 23 }
 0x123   : > { %v547_v54 = vor.u32 4788187, %v546_v53  ;;  %v550_v56 = vcvt.s32.f32 %v543_v52  ;;  %v794_v53 = vld [vmem:[%s1887_s29] sm:$0x1] }
 0x125   : > { %v548_v55 = vand.u32 2147483647, %v547_v54 }
 0x127   : > { %v551_v57 = vmul.f32 %v550_v56, %v548_v55 }
 0x129   : > { %v552_v58 = vxor.u32 2147483648, %v551_v57 }
 0x12b   : > { %v553_v59 = vsel %vm432_vm14, %v552_v58, %v551_v57  ;;  %vm1152_vm14 = vcmask 1048320  }
 0x12c   : > { %v556_v63 = vsel %vm431_vm15, %v2005_v62, %v553_v59  ;;  %v882_v59 = vld [vmem:[%s1884_s7 + $0x8] sm:$0xff] }
 0x12d   : > { %v558_v0 = vmul.f32 %v556_v63, %v556_v63 }
 0x12f   : > { %v559_v1 = vmul.f32 -0.001358992, %v558_v0  ;;  %v566_v2 = vmul.f32 -0.00019511016, %v558_v0 }
 0x131   : > { %v560_v4 = vadd.f32 0.041655596, %v559_v1  ;;  %v567_v6 = vadd.f32 0.008332121, %v566_v2 }
 0x133   : > { %v561_v9 = vmul.f32 %v560_v4, %v558_v0  ;;  %v568_v10 = vmul.f32 %v567_v6, %v558_v0 }
 0x135   : > { %v562_v11 = vadd.f32 -0.4999988, %v561_v9  ;;  %v569_v13 = vadd.f32 -0.16666654, %v568_v10 }
 0x137   : > { %v563_v15 = vmul.f32 %v562_v11, %v558_v0  ;;  %v570_v17 = vmul.f32 %v569_v13, %v558_v0 }
 0x139   : > { %v564_v19 = vadd.f32 1.0, %v563_v15  ;;  %v571_v7 = vadd.f32 1.0, %v570_v17 }
 0x13b   : > { %v572_v22 = vmul.f32 %v571_v7, %v556_v63  ;;  %v581_v23 = vxor.u32 2147483648, %v564_v19 }
 0x13d   : > { %v578_v24 = vxor.u32 2147483648, %v572_v22  ;;  %v582_v27 = vsel %vm580_vm4, %v581_v23, %v572_v22  ;;  %v737_v29 = vsel %vm735_vm5, %v581_v23, %v572_v22 }
 0x13f   : > { %v579_v25 = vsel %vm577_vm3, %v564_v19, %v578_v24  ;;  %v734_v28 = vsel %vm732_vm1, %v564_v19, %v578_v24 }
 0x140   : > { %v583_v31 = vsel %vm576_vm2, %v579_v25, %v582_v27  ;;  %v738_v16 = vsel %vm731_vm0, %v734_v28, %v737_v29 }
 0x141   : > { %v584_v26 = vsel %vm573_vm6, nan, %v583_v31  ;;  %v739_v32 = vsel %vm573_vm6, nan, %v738_v16 }
 0x142   : > { %v585_v33 = vpack.c.bf16 %v584_v26, %v584_v26  ;;  %v740_v34 = vpack.c.bf16 %v739_v32, %v739_v32 }
 0x144   : > { %1564 = vxpose.binary.xlu0.c.b16.start.end [1/2] (short) (narrow) %v585_v33, %v426_v30, 16  ;;  %v763_v35 = vsel %vm761_vm7, %v585_v33, 0  ;;  %v779_v36 = vsel %vm761_vm7, %v740_v34, 0  ;;  %v886_v37 = vunpack.c.l.b16 %v585_v33  ;;  %v929_v39 = vunpack.c.l.b16 %v740_v34 }
 0x145   : > { %846 = vxpose.xlu1.c.b16.start.end [1/1] (short) (narrow) %v740_v34, 16  ;;  %772 = vmatpush.bf16.msra.mxu2 %v763_v35  ;;  %v908_v41 = vpop.permute.xlu2 %907 }
 0x146   : > { %788 = vmatpush.bf16.msra.mxu3 %v779_v36  ;;  %v887_v40 = vpack.c.b16 %v886_v37, %v886_v37  ;;  %v930_v42 = vpack.c.b16 %v929_v39, %v929_v39  ;;  %v913_v45 = vsel %vm761_vm7, %v908_v41, 0 }
 0x148   : > { %888 = vrot.lane.b32.xlu2 %v887_v40, %s1743_s10 }
 0x150   : > { %981 = vrot.lane.b32.xlu2 %v887_v40, %s1744_s11 }
 0x15d   : > { %v826_v61 = vpop.permute.xlu1 %825 }
 0x15e   : > { %v831_v62 = vsel %vm761_vm7, %v826_v61, 0 }
 0x15f   : > { %840 = vmatpush.bf16.msrb.mxu2 %v831_v62  ;;  %872 = vmatpush.bf16.msrb.mxu3 %v831_v62 }
 0x19f   : > { %931 = vrot.lane.b32.xlu1 %v930_v42, %s1743_s10 }
 0x1a2   : > { %v889_v43 = vpop.permute.xlu2 %888 }
 0x1a3   : > { %891 = vxpose.xlu2.c.b16.start.end [1/1] (short) (narrow) %v889_v43, 16 }
 0x1a7   : > { %1071 = vrot.lane.b32.xlu1 %v887_v40, %s1745_s14 }
 0x1aa   : > { %v982_v38 = vpop.permute.xlu2 %981 }
 0x1af   : > { %1000 = vrot.lane.b32.xlu1 %v2015_v12, %s1746_s15  ;;  %v1096_v12 = vsel %vm761_vm7, %v1091_v18, 0 }
 0x1f0   : > { %v1565_v44 = vpop.trf.xlu0 }
 0x1f1   : > { %1419 = vmatmul.msk.bf16.vlgmr.msra.gmra.mxu2 %vm757_vm8, %v1565_v44  ;;  %1420 = vmatmul.msk.bf16.vlgmr.msra.gmra.mxu3 %vm757_vm8, %v1565_v44  ;;  %v854_v48 = vpop.trf.xlu1 }
 0x1f2   : > { %922 = vmatpush.bf16.msra.mxu2 %v913_v45  ;;  %960 = vmatpush.bf16.msra.mxu3 %v913_v45 }
 0x1f8   : > { %v1566_v47 = vpop.trf.xlu0 }
 0x201   : > { %1421 = vmatmul.msk.bf16.vlgmr.msrb.gmra.mxu2 %vm757_vm8, %v1566_v47  ;;  %1422 = vmatmul.msk.bf16.vlgmr.msrb.gmra.mxu3 %vm757_vm8, %v854_v48 }
 0x202   : > { %1105 = vmatpush.bf16.msrb.mxu2 %v1096_v12  ;;  %1140 = vmatpush.bf16.msrb.mxu3 %v1096_v12 }
 0x20c   : > { %1111 = vrot.lane.b32.xlu2 %v930_v42, %s1745_s14 }
 0x211   : > { %v932_v49 = vpop.permute.xlu1 %931 }
 0x212   : > { %934 = vxpose.xlu0.c.b16.start.end [1/1] (short) (narrow) %v932_v49, 16 }
 0x219   : > { %v1072_v50 = vpop.permute.xlu1 %1071 }
 0x221   : > { %v1001_v51 = vpop.permute.xlu1 %1000 }
 0x222   : > { %v1006_v5 = vsel %vm761_vm7, %v1001_v51, 0 }
 0x223   : > { %1015 = vmatpush.bf16.msrb.mxu0 %v1006_v5  ;;  %1050 = vmatpush.bf16.msrb.mxu1 %v1006_v5 }
 0x244   : > { %v899_v52 = vpop.trf.xlu2 }
 0x245   : > { %1423 = vmatmul.msk.bf16.vlgmr.msra.gmra.mxu2 %vm757_vm8, %v899_v52 }
 0x266   : > { %v1112_v21 = vpop.permute.xlu2 %1111 }
 0x274   : > { %v790_v54 = vpop.f32.mrf.mxu3  ;;  %v774_v55 = vpop.f32.mrf.mxu2 }
 0x275   : > { %v795_v56 = vadd.f32 %v794_v53, %v774_v55 }
 0x277   : > { %797 = vst.msk [vmem:[%s1887_s29] sm:$0x1] %vm796_vm9, %v795_v56 }
 0x27c   : > { %v792_v57 = vpop.f32.mrf.mxu3  ;;  %v776_v58 = vpop.f32.mrf.mxu2 }
 0x27e   : > { %v798_v11 = vld [vmem:[%s1887_s29] sm:$0x1] }
 0x280   : > { %1021 = vrot.lane.b32.xlu0 %v930_v42, %s1744_s11 }
 0x284   : > { %v874_v63 = vpop.f32.mrf.mxu3  ;;  %v842_v0 = vpop.f32.mrf.mxu2 }
 0x285   : > { %v883_v1 = vadd.f32 %v882_v59, %v874_v63  ;;  %v879_v2 = vadd.f32 %v878_v60, %v842_v0 }
 0x287   : > { %884 = vst.msk [vmem:[%s1884_s7 + $0x8] sm:$0xff] %vm880_vm10, %v883_v1 }
 0x288   : > { %800 = vrot.lane.b32.xlu0 %v790_v54, %s1746_s15  ;;  %881 = vst.msk [vmem:[%s1884_s7] sm:$0xff] %vm880_vm10, %v879_v2 }
 0x28c   : > { %v876_v3 = vpop.f32.mrf.mxu3  ;;  %v844_v4 = vpop.f32.mrf.mxu2 }
 0x28e   : > { %v974_v22 = vld [vmem:[%s1884_s7 + $0x8] sm:$0xff] }
 0x28f   : > { %v966_v15 = vld [vmem:[%s1884_s7] sm:$0xff] }
 0x2be   : > { %v942_v6 = vpop.trf.xlu0 }
 0x2bf   : > { %1424 = vmatmul.msk.bf16.vlgmr.msra.gmra.mxu3 %vm757_vm8, %v942_v6 }
 0x2c8   : > { %v924_v8 = vpop.f32.mrf.mxu2 }
 0x2c9   : > { %968 = vrot.lane.b32.xlu1 %v924_v8, %s1746_s15 }
 0x2d0   : > { %v926_v9 = vpop.f32.mrf.mxu2 }
 0x2f2   : > { %v1022_v10 = vpop.permute.xlu0 %1021 }
 0x2fa   : > { %v801_v13 = vpop.permute.xlu0 %800 }
 0x2fb   : > { %v803_v14 = vadd.f32 %v801_v13, %v798_v11 }
 0x2fd   : > { %805 = vst.msk [vmem:[%s1887_s29] sm:$0x1] %vm804_vm11, %v803_v14 }
 0x2fe   : > { %1567 = vxpose.binary.xlu1.c.b16.start.end [1/2] (short) (narrow) %v1022_v10, %v982_v38, 16 }
 0x33b   : > { %v969_v17 = vpop.permute.xlu1 %968 }
 0x33c   : > { %v971_v19 = vadd.f32 %v969_v17, %v966_v15 }
 0x33e   : > { %973 = vst.msk [vmem:[%s1884_s7] sm:$0xff] %vm972_vm12, %v971_v19 }
 0x342   : > { %v962_v7 = vpop.f32.mrf.mxu3 }
 0x343   : > { %976 = vrot.lane.b32.xlu2 %v962_v7, %s1746_s15 }
 0x345   : > { %v1056_v32 = vld [vmem:[%s1884_s7] sm:$0xff] }
 0x34a   : > { %v964_v20 = vpop.f32.mrf.mxu3 }
 0x369   : > { %1570 = vxpose.binary.xlu2.c.b16.start.end [1/2] (short) (narrow) %v1112_v21, %v1072_v50, 16 }
 0x39d   : > { %v977_v23 = vpop.permute.xlu2 %976 }
 0x39e   : > { %v979_v24 = vadd.f32 %v977_v23, %v974_v22 }
 0x3a0   : > { %980 = vst.msk [vmem:[%s1884_s7 + $0x8] sm:$0xff] %vm972_vm12, %v979_v24 }
 0x3a7   : > { %v1064_v61 = vld [vmem:[%s1884_s7 + $0x8] sm:$0xff] }
 0x3aa   : > { %v1568_v25 = vpop.trf.xlu1 }
 0x3ab   : > { %1425 = vmatmul.msk.bf16.vlgmr.msrb.gmra.mxu0 %vm757_vm8, %v1568_v25 }
 0x3b2   : > { %v1569_v27 = vpop.trf.xlu1 }
 0x3b3   : > { %1426 = vmatmul.msk.bf16.vlgmr.msrb.gmra.mxu1 %vm757_vm8, %v1569_v27 }
 0x40a   : > { %v1571_v28 = vpop.trf.xlu2 }
 0x40b   : > { %1427 = vmatmul.msk.bf16.vlgmr.msrb.gmra.mxu2 %vm757_vm8, %v1571_v28 }
 0x412   : > { %v1572_v29 = vpop.trf.xlu2 }
 0x413   : > { %1428 = vmatmul.msk.bf16.vlgmr.msrb.gmra.mxu3 %vm757_vm8, %v1572_v29 }
 0x428   : > { %v1017_v30 = vpop.f32.mrf.mxu0 }
 0x429   : > { %1058 = vrot.lane.b32.xlu2 %v1017_v30, %s1734_s8 }
 0x430   : > { %v1052_v31 = vpop.f32.mrf.mxu1  ;;  %v1019_v16 = vpop.f32.mrf.mxu0 }
 0x431   : > { %1066 = vrot.lane.b32.xlu1 %v1052_v31, %s1734_s8 }
 0x438   : > { %v1054_v26 = vpop.f32.mrf.mxu1 }
 0x483   : > { %v1059_v33 = vpop.permute.xlu2 %1058 }
 0x484   : > { %v1061_v34 = vadd.f32 %v1059_v33, %v1056_v32 }
 0x486   : > { %1063 = vst.msk [vmem:[%s1884_s7] sm:$0xff] %vm1062_vm13, %v1061_v34 }
 0x48d   : > { %v1146_v41 = vld [vmem:[%s1884_s7] sm:$0xff] }
 0x48e   : > { %v1107_v35 = vpop.f32.mrf.mxu2 }
 0x48f   : > { %1148 = vrot.lane.b32.xlu0 %v1107_v35, %s1735_s9 }
 0x496   : > { %v1109_v36 = vpop.f32.mrf.mxu2  ;;  %v1142_v37 = vpop.f32.mrf.mxu3 }
 0x497   : > { %1156 = vrot.lane.b32.xlu0 %v1142_v37, %s1735_s9 }
 0x49e   : > { %v1144_v40 = vpop.f32.mrf.mxu3 }
 0x4a3   : > { %v1067_v62 = vpop.permute.xlu1 %1066 }
 0x4a4   : > { %v1069_v39 = vadd.f32 %v1067_v62, %v1064_v61 }
 0x4a6   : > { %1070 = vst.msk [vmem:[%s1884_s7 + $0x8] sm:$0xff] %vm1062_vm13, %v1069_v39 }
 0x4ad   : > { %v1154_v44 = vld [vmem:[%s1884_s7 + $0x8] sm:$0xff] }
 0x501   : > { %v1149_v42 = vpop.permute.xlu0 %1148 }
 0x502   : > { %v1151_v43 = vadd.f32 %v1149_v42, %v1146_v41 }
 0x504   : > { %1153 = vst.msk [vmem:[%s1884_s7] sm:$0xff] %vm1152_vm14, %v1151_v43 }
 0x509   : > { %v1157_v45 = vpop.permute.xlu0 %1156 }
 0x50a   : > { %v1159_v46 = vadd.f32 %v1157_v45, %v1154_v44 }
 0x50c   : > { %1160 = vst.msk [vmem:[%s1884_s7 + $0x8] sm:$0xff] %vm1152_vm14, %v1159_v46 }
 0x50d PF: > { %p1429_p3 = scmp.ne.s32.totalorder %s1705_s25, 1 }
 0x50f   : > { %1164 = sbr.rel (%p1429_p3) target bundleno = 1306 (0x51a), region = 44 }
 0x514   : > { %v1165_v18 = vld [vmem:[%s1884_s7] sm:$0xff]  ;;  %v1166_v47 = vld [vmem:[%s1884_s7 + $0x8] sm:$0xff]  ;;  %vm1173_vm15 = vcmask 516096  }
 0x515   : > { %v1171_v48 = vld [vmem:[%s1887_s29] sm:$0x1]  ;;  %v1167_v12 = vmul.f32 0.35355338, %v1165_v18  ;;  %v1168_v49 = vmul.f32 0.35355338, %v1166_v47 }
 0x516   : > { %v1172_v50 = vmul.f32 0.35355338, %v1171_v48 }
 0x517   : > { %1169 = vst [vmem:[%s1884_s7] sm:$0xff] %v1167_v12 }
 0x518   : > { %1170 = vst [vmem:[%s1884_s7 + $0x8] sm:$0xff] %v1168_v49 }
 0x519   : > { %1174 = vst.msk [vmem:[%s1887_s29] sm:$0x1] %vm1173_vm15, %v1172_v50 }
 0x51a PF: > { %s1431_s25 = sshll.u32 %s1713_s0, 1  ;;  %s1194_s1 = sshll.u32 %s1884_s7, 4  ;;  %s1195_s1 = int_to_ptr.vmem [resolvable:$true] %s1194_s1 }
 0x51b   : > { %s1188_s16 = sadd.s32 %s1709_s26, %s1431_s25  ;;  %s1176_s6 = scalar_lea.sflag [#allocation5], %s1868_s20 }
 0x51c   : > { %s1453_s28 = sshll.u32 %s1188_s16, 4  ;;  %s1605_s26 = scalar_lea.hbm %s2198_s4, 64 }
 0x51d   : > { %s1193_s17 = scalar_lea.hbm %s2198_s4, %s1453_s28 }
 0x51e   : > { %s1196_s18 = sshll.u32 %s1193_s17, 4  ;;  %s1197_s18 = int_to_ptr.hbm [resolvable:$true] %s1196_s18 }
 0x51f   : > { %s1599_s8 = sshra.s32 %s1197_s18, 4  ;;  %s1600_s8 = int_to_ptr.hbm [resolvable:$true] %s1599_s8 }
 0x520   : > { %s1601_s9 = scalar_lea.hbm %s1600_s8, 16  ;;  %p1606_p9 = scmp.lt.s32.totalorder %s1600_s8, %s2198_s4 }
 0x521   : > { %p1602_p4 = scmp.ne.s32.totalorder %s1600_s8, %s1601_s9  ;;  %p1607_p10 = scmp.lt.s32.totalorder %s1605_s26, %s1601_s9 }
 0x523   : > { %p1603_p5 = pnand %p1602_p4, %p1848_p6  ;;  %p1608_p11 = por %p1607_p10, %p1606_p9 }
 0x525   : > { %p1604_p8 = pneg %p1603_p5 }
 0x527   : > { %p1609_p12 = pnand %p1608_p11, %p1604_p8 }
 0x529   : > { %1612 = shalt.err (!%p1609_p12)
}
 0x52a   : > { %s1747_s14 = smov 128   ;;  %s1748_s15 = smov 8  }
 0x52b   : > { %1454 = dma.vmem_to_hbm [thread:$0]  (%p1848_p6), %s1195_s1, 256, %s1197_s18, %s1176_s6, %s1747_s14, %s1747_s14, %s1748_s15  }
 0x52c   : > { %s1210_s21 = scalar_lea.hbm %s2199_s5, %s1188_s16  ;;  %s1212_s27 = sshll.u32 %s1887_s29, 4  ;;  %s1213_s27 = int_to_ptr.vmem [resolvable:$true] %s1212_s27 }
 0x52d   : > { %s1214_s17 = sshll.u32 %s1210_s21, 4  ;;  %s1181_s8 = scalar_lea.sflag [#allocation7], %s1868_s20  ;;  %s1215_s17 = int_to_ptr.hbm [resolvable:$true] %s1214_s17 }
 0x52e   : > { %s1627_s9 = sshra.s32 %s1215_s17, 4  ;;  %s1633_s1 = scalar_lea.hbm %s2199_s5, 4  ;;  %s1628_s9 = int_to_ptr.hbm [resolvable:$true] %s1627_s9 }
 0x52f   : > { %s1629_s10 = scalar_lea.hbm %s1628_s9, 1  ;;  %p1634_p2 = scmp.lt.s32.totalorder %s1628_s9, %s2199_s5 }
 0x530   : > { %p1630_p13 = scmp.ne.s32.totalorder %s1628_s9, %s1629_s10  ;;  %p1635_p3 = scmp.lt.s32.totalorder %s1633_s1, %s1629_s10 }
 0x532   : > { %p1631_p0 = pnand %p1630_p13, %p1848_p6  ;;  %p1636_p4 = por %p1635_p3, %p1634_p2 }
 0x534   : > { %p1632_p1 = pneg %p1631_p0 }
 0x536   : > { %p1637_p5 = pnand %p1636_p4, %p1632_p1 }
 0x538   : > { %1640 = shalt.err (!%p1637_p5)
}
 0x539   : > { %1455 = dma.vmem_to_hbm [thread:$0]  (%p1848_p6), %s1213_s27, 16, %s1215_s17, %s1181_s8  }
 0x53a PF: > { %p1465_p8 = scmp.ge.s32.totalorder %s1729_s30, 2  ;;  %s1226_s29 = sand.u32 1, %s1693_s22  }
 0x53b   : > { %s1227_s20 = scalar_lea.sflag [#allocation5], %s1226_s29 }
 0x53c   : > { %p1459_p9 = pnand %p1465_p8, %p1852_p7 }
 0x53e   : > { %p1460_p10 = pneg %p1459_p9 }
 0x540   : > { %1684 = dma.done.wait (%p1460_p10), %s1227_s20, 256  }
 0x541   : > { %1686 = vsyncadd (%p1460_p10), %s1227_s20, 4294967040  ;;  %s1237_s16 = scalar_lea.sflag [#allocation7], %s1226_s29 }
 0x542   : > { %1688 = dma.done.wait (%p1460_p10), %s1237_s16, 16  }
 0x543   : > { %1690 = vsyncadd (%p1460_p10), %s1237_s16, 4294967280  ;;  %s30_s30 = sadd.s32 1, %s1729_s30   ;;  %s2217_s25 = sld [smem:[#allocation11_spill]] }
 0x544   : > { %p27_p11 = scmp.ge.s32.totalorder %s30_s30, 10   ;;  %s2218_s26 = sld [smem:[#allocation12_spill]] }
 0x545   : > { %s2219_s0 = sld [smem:[#allocation13_spill]]  ;;  %s2223_s22 = smov %s1697_s23 }
 0x546   : > { %s2220_s27 = sld [smem:[#allocation14_spill]]  ;;  %s2224_s23 = smov %s1701_s24 }
 0x547   : > { %s2221_s28 = sld [smem:[#allocation15_spill]]  ;;  %s2225_s24 = smov %s1865_s19 }
 0x548   : > { %s2222_s29 = sld [smem:[#allocation16_spill]]  ;;  %29 = sbr.rel (!%p27_p11) target bundleno = 14 (0xe), region = 96 }
 0x54d   :  { %1242 = vsyncpa [#allocation5], 1 }
 0x54e   :  { %1244 = vsyncpa [#allocation5 + $0x1], 1 }
 0x54f   :  { %1245 = vsyncpa [#allocation7], 1 }
 0x550   :  { %1247 = vsyncpa [#allocation7 + $0x1], 1 }

</bundles_post_ra>
